<compile_context>
chip_gen: v6e
topology: v6e:2x2x1
jax: 0.10.0
libtpu: 0.0.40
codegen_flags: <defaults>
</compile_context>

<pallas_src>
import jax
import jax.numpy as jnp
from jax.experimental import pallas as pl
from jax.experimental.pallas import tpu as pltpu


def receiver_kernel(x_ref, sig_ref, w1_ref, w2_ref, probas_ref, emb_ref):
    G, TB, F = x_ref.shape
    E = w1_ref.shape[1]

    w1 = w1_ref[...]                      # (F, E)  resident in VMEM
    w2 = w2_ref[...]                      # (V, E)  resident in VMEM

    # --- lin2 on the signal: (TB, V) @ (V, E) -> (TB, E) ----------------------
    h_s = jnp.dot(sig_ref[...], w2, preferred_element_type=jnp.float32)

    # --- lin1 per candidate; emb written batch-major into the (TB, G*E) slab --
    out_cols = []
    for g in range(G):                    # static loop, G is small (e.g. 4)
        emb_g = jnp.dot(x_ref[g], w1,
                        preferred_element_type=jnp.float32)      # (TB, E)
        emb_ref[:, g * E:(g + 1) * E] = emb_g.astype(emb_ref.dtype)
        # out[:, g] = <emb_g[b,:], h_s[b,:]>  (VPU mul + XLU lane reduce)
        out_cols.append(jnp.sum(emb_g * h_s, axis=-1, keepdims=True))  # (TB, 1)

    out = jnp.concatenate(out_cols, axis=-1)                     # (TB, G)

    # --- softmax over the game axis (exact divide; HBM-bound so it's free) ----
    m = jnp.max(out, axis=-1, keepdims=True)
    e = jnp.exp(out - m)
    probas = e / jnp.sum(e, axis=-1, keepdims=True)
    probas_ref[...] = probas.astype(probas_ref.dtype)            # (TB, G)


def _pad(n, m):
    return ((n + m - 1) // m) * m


def _tile_vmem_bytes(G, TB, F, E, V, itemsize=4, out_itemsize=4):
    """Padded (lane=128, sublane) double-buffered VMEM footprint estimate."""
    lane = 128
    sub_in = 8 if itemsize >= 4 else 16
    sub_out = 8 if out_itemsize >= 4 else 16
    x_t = G * _pad(TB, sub_in) * _pad(F, lane) * itemsize
    sig_t = _pad(TB, sub_in) * _pad(V, lane) * itemsize
    emb_t = _pad(TB, sub_out) * _pad(G * E, lane) * out_itemsize
    prob_t = _pad(TB, 8) * _pad(G, lane) * 4
    w = (_pad(F, sub_in) * _pad(E, lane) + _pad(V, sub_in) * _pad(E, lane)) * itemsize
    return 2 * (x_t + sig_t + emb_t + prob_t) + w


def _pick_block_b(B, G, F, E, V, itemsize, out_itemsize, budget):
    # Prefer >= 2 grid steps (v7x has 2 TensorCores; "parallel" shards them),
    # biggest lane-multiple tile first so v5e/v6e pay minimal per-step overhead.
    for cand in (2048, 1024, 512, 256, 128):
        if (B % cand == 0 and B // cand >= 2
                and _tile_vmem_bytes(G, cand, F, E, V, itemsize, out_itemsize) <= budget):
            return cand
    # Half-batch fallback (still 2 steps) if it obeys the sublane constraint.
    if (B % 2 == 0 and (B // 2) % 8 == 0
            and _tile_vmem_bytes(G, B // 2, F, E, V, itemsize, out_itemsize) <= budget):
        return B // 2
    return B   # single whole-batch tile (tiny-batch path)


def receiver_forward(x, signal, w1_t, w2_t, *, block_b=None,
                     compute_dtype=None, emb_dtype=jnp.float32):
    """x: (G,B,F), signal: (B,V), w1_t: (F,E), w2_t: (V,E)
       -> (probas (B,G) f32, emb (B,G,E) emb_dtype)."""
    G, B, F = x.shape
    V, E = w2_t.shape
    assert signal.shape == (B, V)
    assert w1_t.shape == (F, E)

    if compute_dtype is not None:  # optional bf16 path: halves dominant HBM reads
        x = x.astype(compute_dtype)
        signal = signal.astype(compute_dtype)
        w1_t = w1_t.astype(compute_dtype)
        w2_t = w2_t.astype(compute_dtype)

    itemsize = jnp.dtype(x.dtype).itemsize
    out_itemsize = jnp.dtype(emb_dtype).itemsize

    # Per-generation VMEM budgeting: query physical VMEM (64 MiB on v7x,
    # 128 MiB on v5e/v6e), request an explicit scoped limit, leave headroom.
    try:
        vmem_cap = int(getattr(pltpu.get_tpu_info(), "vmem_capacity_bytes",
                               64 * 1024 * 1024))
    except Exception:
        vmem_cap = 64 * 1024 * 1024
    vmem_limit = int(min(vmem_cap // 2, 32 * 1024 * 1024))
    budget = (3 * vmem_limit) // 4

    if block_b is None:
        block_b = _pick_block_b(B, G, F, E, V, itemsize, out_itemsize, budget)
    assert B % block_b == 0, "block_b must divide batch"
    assert block_b % 8 == 0 or block_b == B, "block_b must be a sublane multiple"
    grid = (B // block_b,)

    cost = pl.CostEstimate(
        flops=2 * G * B * F * E + 2 * B * V * E + 2 * G * B * E,
        transcendentals=G * B,
        bytes_accessed=(itemsize * (G * B * F + B * V + F * E + V * E)
                        + out_itemsize * G * B * E + 4 * G * B),
    )

    probas, emb_slab = pl.pallas_call(
        receiver_kernel,
        out_shape=(
            jax.ShapeDtypeStruct((B, G), jnp.float32),
            jax.ShapeDtypeStruct((B, G * E), emb_dtype),
        ),
        grid_spec=pltpu.PrefetchScalarGridSpec(
            num_scalar_prefetch=0,
            grid=grid,
            in_specs=[
                pl.BlockSpec((G, block_b, F), lambda i: (0, i, 0)),   # x tile
                pl.BlockSpec((block_b, V), lambda i: (i, 0)),         # signal tile
                pl.BlockSpec((F, E), lambda i: (0, 0)),               # W1 resident
                pl.BlockSpec((V, E), lambda i: (0, 0)),               # W2 resident
            ],
            out_specs=(
                pl.BlockSpec((block_b, G), lambda i: (i, 0)),         # probas (B,G)
                pl.BlockSpec((block_b, G * E), lambda i: (i, 0)),     # emb slab
            ),
        ),
        compiler_params=pltpu.CompilerParams(
            dimension_semantics=("parallel",),
            vmem_limit_bytes=vmem_limit),
        cost_estimate=cost,
    )(x, signal, w1_t, w2_t)

    # Free, contiguous reshape back to the PyTorch (B, G, E) layout.
    emb = emb_slab.reshape(B, G, E)
    return probas, emb


def reference_forward(x, signal, w1_t, w2_t):
    emb = jnp.einsum("gbf,fe->bge", x, w1_t)
    h_s = signal @ w2_t
    out = jnp.einsum("bge,be->bg", emb, h_s)
    probas = jax.nn.softmax(out, axis=1)
    return probas, emb


if __name__ == "__main__":
    # Shapes consistent with the module; batch chosen so the chooser picks
    # block_b=128 -> 2 pipelined grid steps (and both TCs on v7x).
    game_size = 4
    batch = 256
    feat_size = 16
    embedding_size = 32
    vocab_size = 100

    key = jax.random.PRNGKey(0)
    kx, ks, k1, k2 = jax.random.split(key, 4)

    x = jax.random.normal(kx, (game_size, batch, feat_size), dtype=jnp.float32)
    signal = jax.random.normal(ks, (batch, vocab_size), dtype=jnp.float32)

    # init_weights: uniform(-0.08, 0.08); torch Linear weight is (out, in),
    # we store the transpose (in, out) so all matmuls are plain `a @ w`.
    w1_t = jax.random.uniform(
        k1, (feat_size, embedding_size), minval=-0.08, maxval=0.08, dtype=jnp.float32
    )
    w2_t = jax.random.uniform(
        k2, (vocab_size, embedding_size), minval=-0.08, maxval=0.08, dtype=jnp.float32
    )

    # Auto-tiled / pipelined path (block_b chosen by the padded-VMEM heuristic).
    probas, emb = receiver_forward(x, signal, w1_t, w2_t)
    jax.block_until_ready((probas, emb))

    probas_ref, emb_ref = reference_forward(x, signal, w1_t, w2_t)
    assert probas.shape == (batch, game_size)
    assert emb.shape == (batch, game_size, embedding_size)
    assert jnp.allclose(emb, emb_ref, atol=1e-5, rtol=1e-5)
    assert jnp.allclose(probas, probas_ref, atol=1e-5, rtol=1e-4)

    # Also exercise the tiny-batch single-tile fallback path (block_b == B).
    xs, sigs = x[:, :8], signal[:8]
    probas2, emb2 = receiver_forward(xs, sigs, w1_t, w2_t)
    jax.block_until_ready((probas2, emb2))
    p2_ref, e2_ref = reference_forward(xs, sigs, w1_t, w2_t)
    assert jnp.allclose(emb2, e2_ref, atol=1e-5, rtol=1e-5)
    assert jnp.allclose(probas2, p2_ref, atol=1e-5, rtol=1e-4)

    print("KERNEL_OK")
</pallas_src>

<mosaic_0001>
module attributes {stable_mosaic.version = 11 : i64} {
  func.func @receiver_kernel(%arg0: i32, %arg1: memref<4x128x16xf32, #tpu.memory_space<vmem>>, %arg2: memref<128x100xf32, #tpu.memory_space<vmem>>, %arg3: memref<16x32xf32, #tpu.memory_space<vmem>>, %arg4: memref<100x32xf32, #tpu.memory_space<vmem>>, %arg5: memref<128x4xf32, #tpu.memory_space<vmem>>, %arg6: memref<128x128xf32, #tpu.memory_space<vmem>>) attributes {dimension_semantics = [#tpu.dimension_semantics<parallel>], iteration_bounds = array<i64: 2>, scalar_prefetch = 0 : i64, scratch_operands = 0 : i64, tpu.core_type = #tpu.core_type<tc>, window_params = [{transform_indices = @transform_0, window_bounds = array<i64: 4, 128, 16>}, {transform_indices = @transform_1, window_bounds = array<i64: 128, 100>}, {pipeline_mode = #tpu.pipeline_mode<synchronous>, transform_indices = @transform_2, window_bounds = array<i64: 16, 32>}, {pipeline_mode = #tpu.pipeline_mode<synchronous>, transform_indices = @transform_3, window_bounds = array<i64: 100, 32>}, {transform_indices = @transform_4, window_bounds = array<i64: 128, 4>}, {transform_indices = @transform_5, window_bounds = array<i64: 128, 128>}]} {
    %c0 = arith.constant 0 : index
    %c0_0 = arith.constant 0 : index
    %0 = vector.load %arg3[%c0, %c0_0] : memref<16x32xf32, #tpu.memory_space<vmem>>, vector<16x32xf32>
    %c0_1 = arith.constant 0 : index
    %c0_2 = arith.constant 0 : index
    %1 = vector.load %arg4[%c0_1, %c0_2] : memref<100x32xf32, #tpu.memory_space<vmem>>, vector<100x32xf32>
    %c0_3 = arith.constant 0 : index
    %c0_4 = arith.constant 0 : index
    %2 = vector.load %arg2[%c0_3, %c0_4] : memref<128x100xf32, #tpu.memory_space<vmem>>, vector<128x100xf32>
    %cst = arith.constant dense<0.000000e+00> : vector<128x32xf32>
    %3 = tpu.matmul %2, %1, %cst {dimension_numbers = #tpu.dot_dimension_numbers<[1], [0], [0], [1], [0, 0, 1, 1], [], []>} : vector<128x100xf32>, vector<100x32xf32>, vector<128x32xf32> -> vector<128x32xf32>
    %c0_5 = arith.constant 0 : index
    %c0_6 = arith.constant 0 : index
    %c0_7 = arith.constant 0 : index
    %4 = vector.load %arg1[%c0_5, %c0_6, %c0_7] : memref<4x128x16xf32, #tpu.memory_space<vmem>>, vector<1x128x16xf32>
    %5 = vector.shape_cast %4 : vector<1x128x16xf32> to vector<128x16xf32>
    %cst_8 = arith.constant dense<0.000000e+00> : vector<128x32xf32>
    %6 = tpu.matmul %5, %0, %cst_8 {dimension_numbers = #tpu.dot_dimension_numbers<[1], [0], [0], [1], [0, 0, 1, 1], [], []>} : vector<128x16xf32>, vector<16x32xf32>, vector<128x32xf32> -> vector<128x32xf32>
    %c0_9 = arith.constant 0 : index
    %c0_10 = arith.constant 0 : index
    %7 = vector.load %arg6[%c0_9, %c0_10] : memref<128x128xf32, #tpu.memory_space<vmem>>, vector<128x32xf32>
    tpu.vector_store %arg6[%c0_9, %c0_10], %6 {strides = array<i32>} : memref<128x128xf32, #tpu.memory_space<vmem>>, vector<128x32xf32>,
    %8 = arith.mulf %6, %3 : vector<128x32xf32>
    %cst_11 = arith.constant dense<0.000000e+00> : vector<128xf32>
    %9 = vector.multi_reduction <add>, %8, %cst_11 [1] : vector<128x32xf32> to vector<128xf32>
    %10 = vector.shape_cast %9 : vector<128xf32> to vector<128x1xf32>
    %c1 = arith.constant 1 : index
    %c0_12 = arith.constant 0 : index
    %c0_13 = arith.constant 0 : index
    %11 = vector.load %arg1[%c1, %c0_12, %c0_13] : memref<4x128x16xf32, #tpu.memory_space<vmem>>, vector<1x128x16xf32>
    %12 = vector.shape_cast %11 : vector<1x128x16xf32> to vector<128x16xf32>
    %cst_14 = arith.constant dense<0.000000e+00> : vector<128x32xf32>
    %13 = tpu.matmul %12, %0, %cst_14 {dimension_numbers = #tpu.dot_dimension_numbers<[1], [0], [0], [1], [0, 0, 1, 1], [], []>} : vector<128x16xf32>, vector<16x32xf32>, vector<128x32xf32> -> vector<128x32xf32>
    %c0_15 = arith.constant 0 : index
    %c32 = arith.constant 32 : index
    %14 = vector.load %arg6[%c0_15, %c32] : memref<128x128xf32, #tpu.memory_space<vmem>>, vector<128x32xf32>
    tpu.vector_store %arg6[%c0_15, %c32], %13 {strides = array<i32>} : memref<128x128xf32, #tpu.memory_space<vmem>>, vector<128x32xf32>,
    %15 = arith.mulf %13, %3 : vector<128x32xf32>
    %cst_16 = arith.constant dense<0.000000e+00> : vector<128xf32>
    %16 = vector.multi_reduction <add>, %15, %cst_16 [1] : vector<128x32xf32> to vector<128xf32>
    %17 = vector.shape_cast %16 : vector<128xf32> to vector<128x1xf32>
    %c2 = arith.constant 2 : index
    %c0_17 = arith.constant 0 : index
    %c0_18 = arith.constant 0 : index
    %18 = vector.load %arg1[%c2, %c0_17, %c0_18] : memref<4x128x16xf32, #tpu.memory_space<vmem>>, vector<1x128x16xf32>
    %19 = vector.shape_cast %18 : vector<1x128x16xf32> to vector<128x16xf32>
    %cst_19 = arith.constant dense<0.000000e+00> : vector<128x32xf32>
    %20 = tpu.matmul %19, %0, %cst_19 {dimension_numbers = #tpu.dot_dimension_numbers<[1], [0], [0], [1], [0, 0, 1, 1], [], []>} : vector<128x16xf32>, vector<16x32xf32>, vector<128x32xf32> -> vector<128x32xf32>
    %c0_20 = arith.constant 0 : index
    %c64 = arith.constant 64 : index
    %21 = vector.load %arg6[%c0_20, %c64] : memref<128x128xf32, #tpu.memory_space<vmem>>, vector<128x32xf32>
    tpu.vector_store %arg6[%c0_20, %c64], %20 {strides = array<i32>} : memref<128x128xf32, #tpu.memory_space<vmem>>, vector<128x32xf32>,
    %22 = arith.mulf %20, %3 : vector<128x32xf32>
    %cst_21 = arith.constant dense<0.000000e+00> : vector<128xf32>
    %23 = vector.multi_reduction <add>, %22, %cst_21 [1] : vector<128x32xf32> to vector<128xf32>
    %24 = vector.shape_cast %23 : vector<128xf32> to vector<128x1xf32>
    %c3 = arith.constant 3 : index
    %c0_22 = arith.constant 0 : index
    %c0_23 = arith.constant 0 : index
    %25 = vector.load %arg1[%c3, %c0_22, %c0_23] : memref<4x128x16xf32, #tpu.memory_space<vmem>>, vector<1x128x16xf32>
    %26 = vector.shape_cast %25 : vector<1x128x16xf32> to vector<128x16xf32>
    %cst_24 = arith.constant dense<0.000000e+00> : vector<128x32xf32>
    %27 = tpu.matmul %26, %0, %cst_24 {dimension_numbers = #tpu.dot_dimension_numbers<[1], [0], [0], [1], [0, 0, 1, 1], [], []>} : vector<128x16xf32>, vector<16x32xf32>, vector<128x32xf32> -> vector<128x32xf32>
    %c0_25 = arith.constant 0 : index
    %c96 = arith.constant 96 : index
    %28 = vector.load %arg6[%c0_25, %c96] : memref<128x128xf32, #tpu.memory_space<vmem>>, vector<128x32xf32>
    tpu.vector_store %arg6[%c0_25, %c96], %27 {strides = array<i32>} : memref<128x128xf32, #tpu.memory_space<vmem>>, vector<128x32xf32>,
    %29 = arith.mulf %27, %3 : vector<128x32xf32>
    %cst_26 = arith.constant dense<0.000000e+00> : vector<128xf32>
    %30 = vector.multi_reduction <add>, %29, %cst_26 [1] : vector<128x32xf32> to vector<128xf32>
    %31 = vector.shape_cast %30 : vector<128xf32> to vector<128x1xf32>
    %32 = tpu.concatenate %10, %17, %24, %31 in 1 : vector<128x1xf32>, vector<128x1xf32>, vector<128x1xf32>, vector<128x1xf32> -> vector<128x4xf32>
    %cst_27 = arith.constant dense<0xFF800000> : vector<128xf32>
    %33 = vector.multi_reduction <maximumf>, %32, %cst_27 [1] : vector<128x4xf32> to vector<128xf32>
    %34 = vector.shape_cast %33 : vector<128xf32> to vector<128x1xf32>
    %35 = vector.broadcast %34 : vector<128x1xf32> to vector<128x4xf32>
    %36 = arith.subf %32, %35 : vector<128x4xf32>
    %37 = math.exp %36 : vector<128x4xf32>
    %cst_28 = arith.constant dense<0.000000e+00> : vector<128xf32>
    %38 = vector.multi_reduction <add>, %37, %cst_28 [1] : vector<128x4xf32> to vector<128xf32>
    %39 = vector.shape_cast %38 : vector<128xf32> to vector<128x1xf32>
    %40 = vector.broadcast %39 : vector<128x1xf32> to vector<128x4xf32>
    %41 = arith.divf %37, %40 : vector<128x4xf32>
    %c0_29 = arith.constant 0 : index
    %c0_30 = arith.constant 0 : index
    %42 = vector.load %arg5[%c0_29, %c0_30] : memref<128x4xf32, #tpu.memory_space<vmem>>, vector<128x4xf32>
    tpu.vector_store %arg5[%c0_29, %c0_30], %41 {strides = array<i32>} : memref<128x4xf32, #tpu.memory_space<vmem>>, vector<128x4xf32>,
    return
  }
  func.func @transform_0(%arg0: i32) -> (i32, i32, i32) {
    %c0_i32 = arith.constant 0 : i32
    %c0_i32_0 = arith.constant 0 : i32
    %c0_i32_1 = arith.constant 0 : i32
    return %c0_i32, %arg0, %c0_i32_0 : i32, i32, i32
  }
  func.func @transform_1(%arg0: i32) -> (i32, i32) {
    %c0_i32 = arith.constant 0 : i32
    %c0_i32_0 = arith.constant 0 : i32
    return %arg0, %c0_i32 : i32, i32
  }
  func.func @transform_2(%arg0: i32) -> (i32, i32) {
    %c0_i32 = arith.constant 0 : i32
    %c0_i32_0 = arith.constant 0 : i32
    %c0_i32_1 = arith.constant 0 : i32
    return %c0_i32, %c0_i32_0 : i32, i32
  }
  func.func @transform_3(%arg0: i32) -> (i32, i32) {
    %c0_i32 = arith.constant 0 : i32
    %c0_i32_0 = arith.constant 0 : i32
    %c0_i32_1 = arith.constant 0 : i32
    return %c0_i32, %c0_i32_0 : i32, i32
  }
  func.func @transform_4(%arg0: i32) -> (i32, i32) {
    %c0_i32 = arith.constant 0 : i32
    %c0_i32_0 = arith.constant 0 : i32
    return %arg0, %c0_i32 : i32, i32
  }
  func.func @transform_5(%arg0: i32) -> (i32, i32) {
    %c0_i32 = arith.constant 0 : i32
    %c0_i32_0 = arith.constant 0 : i32
    return %arg0, %c0_i32 : i32, i32
  }
}

</mosaic_0001>

<bundles_post_ra>
// kernel: tpu_custom_call.1
= control target key start
LH: loop header
LB: loop body
LE: loop exit
PB: predicated region body
PF: predicated region fallthrough
CT: control target
= control target key end

     0   :  { %11 = vsyncpa [#allocation4], 0  ;;  %s4377_s0 = inlined_call_operand.vmem [shape: f32[4,256,16], index: 0, kind: input, shape index: {}]   ;;  %s4378_s1 = inlined_call_operand.vmem [shape: f32[256,100], index: 1, kind: input, shape index: {}]   ;;  %s4379_s2 = inlined_call_operand.vmem [shape: f32[16,32], index: 2, kind: input, shape index: {}]   ;;  %s4380_s3 = inlined_call_operand.vmem [shape: f32[100,32], index: 3, kind: input, shape index: {}]   ;;  %s4381_s4 = inlined_call_operand.vmem [shape: f32[256,4], index: 4, kind: output, shape index: {0}]   ;;  %s4382_s5 = inlined_call_operand.hbm [shape: f32[256,128], index: 5, kind: output, shape index: {1}]  }
   0x1   :  { %13 = vsyncpa [#allocation4 + $0x1], 0  ;;  %s3128_s18 = smov 0   ;;  %s3130_s19 = smov 0  }
   0x2   :  { %s3132_s20 = smov 0   ;;  %s3134_s21 = smov 0  }
   0x3 LB: > { %s3149_s22 = sadd.s32 4294967295, %s3090_s21   ;;  %s2506_s23 = sadd.s32 4294967294, %s3090_s21   ;;  %s3090_s21 = sphi %s3134_s21, %s4388_s21   ;;  %s3086_s20 = sphi %s3132_s20, %s4387_s20   ;;  %s3082_s19 = sphi %s3130_s19, %s4386_s19   ;;  %s3078_s18 = sphi %s3128_s18, %s4385_s18  }
   0x4   : > { %s3153_s24 = sadd.s32 1, %s3090_s21   ;;  %s26_s25 = sadd.s32 1, %s3086_s20 }
   0x5   : > { %s23_s26 = ssub.s32 %s3090_s21, %s3153_s24  ;;  %p33_p0 = scmp.ne.s32.totalorder %s3086_s20, %s3082_s19 }
   0x6   : > { %p24_p1 = scmp.eq.s32.totalorder %s23_s26, 0  ;;  %p34_p2 = scmp.eq.s32.totalorder %s3090_s21, 0 }
   0x7   : > { %p157_p3 = scmp.eq.s32.totalorder %s3149_s22, 1  ;;  %p162_p4 = scmp.ne.s32.totalorder %s3082_s19, %s3078_s18 }
   0x8   : > { %s3165_s27 = scalar_select %p24_p1, %s3086_s20, %s26_s25  }
   0x9   : > { %p35_p5 = por %p34_p2, %p33_p0  ;;  %p3167_p6 = por %p157_p3, %p33_p0 }
   0xa   : > { %p163_p7 = scmp.eq.s32.totalorder %s2506_s23, 1  ;;  %p2508_p9 = scmp.ge.s32.totalorder %s3090_s21, 2 }
   0xc   : > { %p3171_p8 = por %p163_p7, %p162_p4  ;;  %185 = sbr.rel (%p2508_p9) target bundleno = 53 (0x35), region = 24 }
  0x11   : > { %188 = sbr.rel (!%p35_p5) target bundleno = 53 (0x35), region = 28  ;;  %s190_s30 = sand.u32 (%p35_p5), 1, %s3086_s20  }
  0x12   : > { %s2653_s6 = sshll.u32 (%p35_p5), %s3090_s21, 7  ;;  %s2509_s7 = sshll.u32 (%p35_p5), %s190_s30, 9 }
  0x13   : > { %s3183_s10 = scalar_lea.vmem (%p35_p5), %s4377_s0, %s2653_s6  ;;  %s3188_s11 = scalar_lea.vmem (%p35_p5), [#allocation2], %s2509_s7 }
  0x14   : > { %v350_v0 = vld [vmem:[%s3183_s10] sm:$0xff] (%p35_p5)  ;;  %v352_v1 = vld [vmem:[%s3183_s10 + $0x8] sm:$0xff] (%p35_p5)  ;;  %v354_v2 = vld [vmem:[%s3183_s10 + $0x10] sm:$0xff] (%p35_p5) }
  0x15   : > { %351 = vst [vmem:[%s3188_s11] sm:$0xff] (%p35_p5), %v350_v0  ;;  %353 = vst [vmem:[%s3188_s11 + $0x8] sm:$0xff] (%p35_p5), %v352_v1  ;;  %v356_v3 = vld [vmem:[%s3183_s10 + $0x18] sm:$0xff] (%p35_p5)  ;;  %v358_v4 = vld [vmem:[%s3183_s10 + $0x20] sm:$0xff] (%p35_p5) }
  0x16   : > { %355 = vst [vmem:[%s3188_s11 + $0x10] sm:$0xff] %v354_v2  ;;  %v360_v5 = vld [vmem:[%s3183_s10 + $0x28] sm:$0xff]  ;;  %357 = vst [vmem:[%s3188_s11 + $0x18] sm:$0xff] %v356_v3  ;;  %v362_v6 = vld [vmem:[%s3183_s10 + $0x30] sm:$0xff] }
  0x17   : > { %359 = vst [vmem:[%s3188_s11 + $0x20] sm:$0xff] %v358_v4  ;;  %361 = vst [vmem:[%s3188_s11 + $0x28] sm:$0xff] %v360_v5  ;;  %v364_v7 = vld [vmem:[%s3183_s10 + $0x38] sm:$0xff]  ;;  %v366_v8 = vld [vmem:[%s3183_s10 + $0x40] sm:$0xff] }
  0x18   : > { %363 = vst [vmem:[%s3188_s11 + $0x30] sm:$0xff] %v362_v6  ;;  %365 = vst [vmem:[%s3188_s11 + $0x38] sm:$0xff] %v364_v7  ;;  %v368_v9 = vld [vmem:[%s3183_s10 + $0x48] sm:$0xff]  ;;  %v370_v10 = vld [vmem:[%s3183_s10 + $0x50] sm:$0xff] }
  0x19   : > { %367 = vst [vmem:[%s3188_s11 + $0x40] sm:$0xff] %v366_v8  ;;  %v372_v11 = vld [vmem:[%s3183_s10 + $0x58] sm:$0xff]  ;;  %369 = vst [vmem:[%s3188_s11 + $0x48] sm:$0xff] %v368_v9  ;;  %v374_v12 = vld [vmem:[%s3183_s10 + $0x60] sm:$0xff] }
  0x1a   : > { %371 = vst [vmem:[%s3188_s11 + $0x50] sm:$0xff] %v370_v10  ;;  %373 = vst [vmem:[%s3188_s11 + $0x58] sm:$0xff] %v372_v11  ;;  %v376_v13 = vld [vmem:[%s3183_s10 + $0x68] sm:$0xff]  ;;  %v378_v14 = vld [vmem:[%s3183_s10 + $0x70] sm:$0xff] }
  0x1b   : > { %375 = vst [vmem:[%s3188_s11 + $0x60] sm:$0xff] %v374_v12  ;;  %377 = vst [vmem:[%s3188_s11 + $0x68] sm:$0xff] %v376_v13  ;;  %v380_v15 = vld [vmem:[%s3183_s10 + $0x78] sm:$0xff]  ;;  %v382_v16 = vld [vmem:[%s3183_s10 + $0x100] sm:$0xff] }
  0x1c   : > { %379 = vst [vmem:[%s3188_s11 + $0x70] sm:$0xff] %v378_v14  ;;  %v384_v17 = vld [vmem:[%s3183_s10 + $0x108] sm:$0xff]  ;;  %381 = vst [vmem:[%s3188_s11 + $0x78] sm:$0xff] %v380_v15  ;;  %v386_v18 = vld [vmem:[%s3183_s10 + $0x110] sm:$0xff] }
  0x1d   : > { %383 = vst [vmem:[%s3188_s11 + $0x80] sm:$0xff] %v382_v16  ;;  %385 = vst [vmem:[%s3188_s11 + $0x88] sm:$0xff] %v384_v17  ;;  %v388_v19 = vld [vmem:[%s3183_s10 + $0x118] sm:$0xff]  ;;  %v390_v20 = vld [vmem:[%s3183_s10 + $0x120] sm:$0xff] }
  0x1e   : > { %387 = vst [vmem:[%s3188_s11 + $0x90] sm:$0xff] %v386_v18  ;;  %389 = vst [vmem:[%s3188_s11 + $0x98] sm:$0xff] %v388_v19  ;;  %v392_v21 = vld [vmem:[%s3183_s10 + $0x128] sm:$0xff]  ;;  %v394_v22 = vld [vmem:[%s3183_s10 + $0x130] sm:$0xff] }
  0x1f   : > { %391 = vst [vmem:[%s3188_s11 + $0xa0] sm:$0xff] %v390_v20  ;;  %v396_v23 = vld [vmem:[%s3183_s10 + $0x138] sm:$0xff]  ;;  %393 = vst [vmem:[%s3188_s11 + $0xa8] sm:$0xff] %v392_v21  ;;  %v398_v24 = vld [vmem:[%s3183_s10 + $0x140] sm:$0xff] }
  0x20   : > { %395 = vst [vmem:[%s3188_s11 + $0xb0] sm:$0xff] %v394_v22  ;;  %397 = vst [vmem:[%s3188_s11 + $0xb8] sm:$0xff] %v396_v23  ;;  %v400_v25 = vld [vmem:[%s3183_s10 + $0x148] sm:$0xff]  ;;  %v402_v26 = vld [vmem:[%s3183_s10 + $0x150] sm:$0xff] }
  0x21   : > { %399 = vst [vmem:[%s3188_s11 + $0xc0] sm:$0xff] %v398_v24  ;;  %401 = vst [vmem:[%s3188_s11 + $0xc8] sm:$0xff] %v400_v25  ;;  %v404_v27 = vld [vmem:[%s3183_s10 + $0x158] sm:$0xff]  ;;  %v406_v28 = vld [vmem:[%s3183_s10 + $0x160] sm:$0xff] }
  0x22   : > { %403 = vst [vmem:[%s3188_s11 + $0xd0] sm:$0xff] %v402_v26  ;;  %v408_v29 = vld [vmem:[%s3183_s10 + $0x168] sm:$0xff]  ;;  %405 = vst [vmem:[%s3188_s11 + $0xd8] sm:$0xff] %v404_v27  ;;  %v410_v30 = vld [vmem:[%s3183_s10 + $0x170] sm:$0xff] }
  0x23   : > { %407 = vst [vmem:[%s3188_s11 + $0xe0] sm:$0xff] %v406_v28  ;;  %409 = vst [vmem:[%s3188_s11 + $0xe8] sm:$0xff] %v408_v29  ;;  %v412_v31 = vld [vmem:[%s3183_s10 + $0x178] sm:$0xff]  ;;  %v414_v32 = vld [vmem:[%s3183_s10 + $0x200] sm:$0xff] }
  0x24   : > { %411 = vst [vmem:[%s3188_s11 + $0xf0] sm:$0xff] %v410_v30  ;;  %413 = vst [vmem:[%s3188_s11 + $0xf8] sm:$0xff] %v412_v31  ;;  %v416_v33 = vld [vmem:[%s3183_s10 + $0x208] sm:$0xff]  ;;  %v418_v34 = vld [vmem:[%s3183_s10 + $0x210] sm:$0xff] }
  0x25   : > { %415 = vst [vmem:[%s3188_s11 + $0x100] sm:$0xff] %v414_v32  ;;  %v420_v35 = vld [vmem:[%s3183_s10 + $0x218] sm:$0xff]  ;;  %417 = vst [vmem:[%s3188_s11 + $0x108] sm:$0xff] %v416_v33  ;;  %v422_v36 = vld [vmem:[%s3183_s10 + $0x220] sm:$0xff] }
  0x26   : > { %419 = vst [vmem:[%s3188_s11 + $0x110] sm:$0xff] %v418_v34  ;;  %421 = vst [vmem:[%s3188_s11 + $0x118] sm:$0xff] %v420_v35  ;;  %v424_v37 = vld [vmem:[%s3183_s10 + $0x228] sm:$0xff]  ;;  %v426_v38 = vld [vmem:[%s3183_s10 + $0x230] sm:$0xff] }
  0x27   : > { %423 = vst [vmem:[%s3188_s11 + $0x120] sm:$0xff] %v422_v36  ;;  %425 = vst [vmem:[%s3188_s11 + $0x128] sm:$0xff] %v424_v37  ;;  %v428_v39 = vld [vmem:[%s3183_s10 + $0x238] sm:$0xff]  ;;  %v430_v40 = vld [vmem:[%s3183_s10 + $0x240] sm:$0xff] }
  0x28   : > { %427 = vst [vmem:[%s3188_s11 + $0x130] sm:$0xff] %v426_v38  ;;  %v432_v41 = vld [vmem:[%s3183_s10 + $0x248] sm:$0xff]  ;;  %429 = vst [vmem:[%s3188_s11 + $0x138] sm:$0xff] %v428_v39  ;;  %v434_v42 = vld [vmem:[%s3183_s10 + $0x250] sm:$0xff] }
  0x29   : > { %431 = vst [vmem:[%s3188_s11 + $0x140] sm:$0xff] %v430_v40  ;;  %433 = vst [vmem:[%s3188_s11 + $0x148] sm:$0xff] %v432_v41  ;;  %v436_v43 = vld [vmem:[%s3183_s10 + $0x258] sm:$0xff]  ;;  %v438_v44 = vld [vmem:[%s3183_s10 + $0x260] sm:$0xff] }
  0x2a   : > { %435 = vst [vmem:[%s3188_s11 + $0x150] sm:$0xff] %v434_v42  ;;  %437 = vst [vmem:[%s3188_s11 + $0x158] sm:$0xff] %v436_v43  ;;  %v440_v45 = vld [vmem:[%s3183_s10 + $0x268] sm:$0xff]  ;;  %v442_v46 = vld [vmem:[%s3183_s10 + $0x270] sm:$0xff] }
  0x2b   : > { %439 = vst [vmem:[%s3188_s11 + $0x160] sm:$0xff] %v438_v44  ;;  %v444_v47 = vld [vmem:[%s3183_s10 + $0x278] sm:$0xff]  ;;  %441 = vst [vmem:[%s3188_s11 + $0x168] sm:$0xff] %v440_v45  ;;  %v446_v48 = vld [vmem:[%s3183_s10 + $0x300] sm:$0xff] }
  0x2c   : > { %443 = vst [vmem:[%s3188_s11 + $0x170] sm:$0xff] %v442_v46  ;;  %445 = vst [vmem:[%s3188_s11 + $0x178] sm:$0xff] %v444_v47  ;;  %v448_v49 = vld [vmem:[%s3183_s10 + $0x308] sm:$0xff]  ;;  %v450_v50 = vld [vmem:[%s3183_s10 + $0x310] sm:$0xff] }
  0x2d   : > { %447 = vst [vmem:[%s3188_s11 + $0x180] sm:$0xff] %v446_v48  ;;  %449 = vst [vmem:[%s3188_s11 + $0x188] sm:$0xff] %v448_v49  ;;  %v452_v51 = vld [vmem:[%s3183_s10 + $0x318] sm:$0xff]  ;;  %v454_v52 = vld [vmem:[%s3183_s10 + $0x320] sm:$0xff] }
  0x2e   : > { %451 = vst [vmem:[%s3188_s11 + $0x190] sm:$0xff] %v450_v50  ;;  %v456_v53 = vld [vmem:[%s3183_s10 + $0x328] sm:$0xff]  ;;  %453 = vst [vmem:[%s3188_s11 + $0x198] sm:$0xff] %v452_v51  ;;  %v458_v54 = vld [vmem:[%s3183_s10 + $0x330] sm:$0xff] }
  0x2f   : > { %455 = vst [vmem:[%s3188_s11 + $0x1a0] sm:$0xff] %v454_v52  ;;  %457 = vst [vmem:[%s3188_s11 + $0x1a8] sm:$0xff] %v456_v53  ;;  %v460_v55 = vld [vmem:[%s3183_s10 + $0x338] sm:$0xff]  ;;  %v462_v56 = vld [vmem:[%s3183_s10 + $0x340] sm:$0xff] }
  0x30   : > { %459 = vst [vmem:[%s3188_s11 + $0x1b0] sm:$0xff] %v458_v54  ;;  %461 = vst [vmem:[%s3188_s11 + $0x1b8] sm:$0xff] %v460_v55  ;;  %v464_v57 = vld [vmem:[%s3183_s10 + $0x348] sm:$0xff]  ;;  %v466_v58 = vld [vmem:[%s3183_s10 + $0x350] sm:$0xff] }
  0x31   : > { %463 = vst [vmem:[%s3188_s11 + $0x1c0] sm:$0xff] %v462_v56  ;;  %v468_v59 = vld [vmem:[%s3183_s10 + $0x358] sm:$0xff]  ;;  %465 = vst [vmem:[%s3188_s11 + $0x1c8] sm:$0xff] %v464_v57  ;;  %v470_v60 = vld [vmem:[%s3183_s10 + $0x360] sm:$0xff] }
  0x32   : > { %467 = vst [vmem:[%s3188_s11 + $0x1d0] sm:$0xff] %v466_v58  ;;  %469 = vst [vmem:[%s3188_s11 + $0x1d8] sm:$0xff] %v468_v59  ;;  %v472_v61 = vld [vmem:[%s3183_s10 + $0x368] sm:$0xff]  ;;  %v474_v62 = vld [vmem:[%s3183_s10 + $0x370] sm:$0xff] }
  0x33   : > { %471 = vst [vmem:[%s3188_s11 + $0x1e0] sm:$0xff] %v470_v60  ;;  %473 = vst [vmem:[%s3188_s11 + $0x1e8] sm:$0xff] %v472_v61  ;;  %v476_v63 = vld [vmem:[%s3183_s10 + $0x378] sm:$0xff] }
  0x34   : > { %475 = vst [vmem:[%s3188_s11 + $0x1f0] sm:$0xff] %v474_v62  ;;  %477 = vst [vmem:[%s3188_s11 + $0x1f8] sm:$0xff] %v476_v63 }
  0x35 PF: > { %p2512_p10 = scmp.ge.s32.totalorder %s3090_s21, 1  ;;  %p491_p11 = scmp.lt.s32.totalorder %s3090_s21, 3 }
  0x37   : > { %p492_p12 = pnand %p2512_p10, %p491_p11 }
  0x38   : > { %s3329_s23 = sand.u32 (!%p492_p12), 1, %s3082_s19   ;;  %s2515_s9 = sshll.u32 (!%p492_p12), %s3149_s22, 4 }
  0x39   : > { %495 = sbr.rel (%p492_p12) target bundleno = 1795 (0x703), region = 70  ;;  %s2513_s30 = sshll.u32 (!%p492_p12), %s3329_s23, 9 }
  0x3a   : > { %s3343_s8 = scalar_lea.vmem (!%p492_p12), [#allocation2], %s2513_s30  ;;  %p537_p13 = scmp.lt.s32.totalorder (!%p492_p12), %s2515_s9, 31 }
  0x3b   : > { %s3092_s11 = smov (!%p492_p12), 32   ;;  %s3094_s12 = smov (!%p492_p12), 96  }
  0x3c   : > { %s2384_s6 = scalar_lea.sflag (!%p492_p12), [#allocation4], %s3329_s23 }
  0x3e   : > { %v563_v0 = vld [vmem:[%s4380_s3 + $0x60] sm:$0xf]  ;;  %vm629_vm0 = vcmask 1043456   ;;  %v3323_v1 = vld [vmem:[%s4379_s2 + $0x8] sm:$0xff]  ;;  %v562_v2 = vld [vmem:[%s4380_s3 + $0x58] sm:$0xff]  ;;  %vm794_vm1 = vcmask 130048  }
  0x3f   : > { %2756 = vmatprep.subr.msk.mxu0 %vm629_vm0, %v563_v0  ;;  %2918 = vmatprep.subr.mxu1 %v3323_v1  ;;  %v3335_v3 = vld [vmem:[%s4379_s2] sm:$0xff]  ;;  %v561_v4 = vld [vmem:[%s4380_s3 + $0x50] sm:$0xff]  ;;  %v781_v6 = vld [vmem:[%s3343_s8 + $0x18] sm:$0xff]  ;;  %s4390_s9 = smov (!%p537_p13, %s2515_s9), 31  ;;  %vm580_vm2 = vcmask 818176   ;;  %vm988_vm3 = vcmask 261120  }
  0x40   : > { %2757 = vmatpush3.msk.msra.mxu0 %vm629_vm0, %v563_v0  ;;  %2920 = vmatpush3.msra.mxu1 %v3323_v1  ;;  %v780_v5 = vld [vmem:[%s3343_s8 + $0x10] sm:$0xff]  ;;  %v560_v7 = vld [vmem:[%s4380_s3 + $0x48] sm:$0xff]  ;;  %v782_v8 = vld [vmem:[%s3343_s8 + $0x20] sm:$0xff]  ;;  %s2516_s14 = sshll.u32 %s4390_s9, 3  ;;  %vm1343_vm4 = vcmask 523520   ;;  %vm1698_vm5 = vcmask 785920  }
  0x41   : > { %2758 = vmatprep.subr.mxu0 %v562_v2  ;;  %2919 = vmatprep.subr.mxu1 %v3335_v3  ;;  %v559_v9 = vld [vmem:[%s4380_s3 + $0x40] sm:$0xff]  ;;  %v783_v10 = vld [vmem:[%s3343_s8 + $0x28] sm:$0xff]  ;;  %v784_v11 = vld [vmem:[%s3343_s8 + $0x30] sm:$0xff]  ;;  %s3375_s26 = scalar_lea.vmem %s4378_s1, %s2516_s14  ;;  %vm2053_vm6 = vcmask 1048320   ;;  %vm2151_vm7 = vcmask 15360   ;;  %vm2134_vm8 = vcmask 7168   ;;  %s4271_s16 = scalar_lea.vmem %s4381_s4, %s2516_s14 }
  0x42   : > { %2759 = vmatpush3.msra.mxu0 %v562_v2  ;;  %2921 = vmatpush3.msra.mxu1 %v3335_v3  ;;  %v558_v12 = vld [vmem:[%s4380_s3 + $0x38] sm:$0xff]  ;;  %v564_v13 = vld [vmem:[%s3375_s26] sm:$0xff]  ;;  %v557_v14 = vld [vmem:[%s4380_s3 + $0x30] sm:$0xff]  ;;  %vm2168_vm9 = vcmask 23552   ;;  %vm2185_vm10 = vcmask 31744   ;;  %s2654_s9 = sshll.u32 %s3149_s22, 11 }
  0x43   : > { %2813 = vmatprep.mubr.msk.f32.mxu1 %vm794_vm1, %v780_v5  ;;  %2760 = vmatprep.subr.mxu0 %v561_v4  ;;  %v785_v15 = vld [vmem:[%s3343_s8 + $0x38] sm:$0xff]  ;;  %v786_v16 = vld [vmem:[%s3343_s8 + $0x40] sm:$0xff]  ;;  %v556_v17 = vld [vmem:[%s4380_s3 + $0x28] sm:$0xff]  ;;  %s4324_s30 = scalar_lea.hbm %s4382_s5, %s2654_s9  ;;  %s3095_s22 = smov [#allocation3]  }
  0x44   : > { %2814 = vmatmul.mubr.msk.f32.vlgmr.msra.gmra.mxu1 %vm794_vm1, %v781_v6  ;;  %2834 = vmatprep.subr.mxu1 %v3323_v1  ;;  %v555_v18 = vld [vmem:[%s4380_s3 + $0x20] sm:$0xff]  ;;  %v787_v19 = vld [vmem:[%s3343_s8 + $0x48] sm:$0xff]  ;;  %v788_v20 = vld [vmem:[%s3343_s8 + $0x50] sm:$0xff] }
  0x45   : > { %2761 = vmatpush3.msra.mxu0 %v561_v4  ;;  %2835 = vmatpush3.msra.mxu1 %v3323_v1  ;;  %v554_v21 = vld [vmem:[%s4380_s3 + $0x18] sm:$0xff]  ;;  %v553_v22 = vld [vmem:[%s4380_s3 + $0x10] sm:$0xff]  ;;  %v790_v24 = vld [vmem:[%s3343_s8 + $0x60] sm:$0xff] }
  0x46   : > { %2762 = vmatprep.subr.mxu0 %v560_v7  ;;  %2816 = vmatprep.mubr.msk.f32.mxu1 %vm794_vm1, %v782_v8  ;;  %v789_v23 = vld [vmem:[%s3343_s8 + $0x58] sm:$0xff]  ;;  %v552_v25 = vld [vmem:[%s4380_s3 + $0x8] sm:$0xff]  ;;  %v551_v26 = vld [vmem:[%s4380_s3] sm:$0xff] }
  0x47   : > { %2763 = vmatpush3.msra.mxu0 %v560_v7  ;;  %2836 = vmatprep.subr.mxu1 %v3335_v3  ;;  %v791_v27 = vld [vmem:[%s3343_s8 + $0x68] sm:$0xff]  ;;  %v792_v28 = vld [vmem:[%s3343_s8 + $0x70] sm:$0xff]  ;;  %v793_v31 = vld [vmem:[%s3343_s8 + $0x78] sm:$0xff] }
  0x48   : > { %2764 = vmatprep.subr.mxu0 %v559_v9  ;;  %2817 = vmatmul.mubr.msk.f32.gmra.mxu1 %vm794_vm1, %v783_v10  ;;  %v565_v29 = vld [vmem:[%s3375_s26 + $0x8] sm:$0xff]  ;;  %v566_v30 = vld [vmem:[%s3375_s26 + $0x10] sm:$0xff]  ;;  %v2552_v32 = vld [vmem:[%s3343_s8 + $0x80] sm:$0xff] }
  0x49   : > { %2765 = vmatpush3.msra.mxu0 %v559_v9  ;;  %2819 = vmatprep.mubr.msk.f32.mxu1 %vm794_vm1, %v784_v11  ;;  %v567_v33 = vld [vmem:[%s3375_s26 + $0x18] sm:$0xff]  ;;  %v568_v34 = vld [vmem:[%s3375_s26 + $0x20] sm:$0xff]  ;;  %v2553_v35 = vld [vmem:[%s3343_s8 + $0x88] sm:$0xff] }
  0x4a   : > { %2766 = vmatprep.subr.mxu0 %v558_v12  ;;  %2837 = vmatpush3.msra.mxu1 %v3335_v3  ;;  %v2554_v36 = vld [vmem:[%s3343_s8 + $0x90] sm:$0xff]  ;;  %v569_v37 = vld [vmem:[%s3375_s26 + $0x28] sm:$0xff]  ;;  %v2555_v39 = vld [vmem:[%s3343_s8 + $0x98] sm:$0xff] }
  0x4b   : > { %2767 = vmatpush3.msra.mxu0 %v558_v12  ;;  %2782 = vmatprep.mubr.msk.f32.mxu0 %vm580_vm2, %v564_v13  ;;  %v570_v38 = vld [vmem:[%s3375_s26 + $0x30] sm:$0xff]  ;;  %v2556_v40 = vld [vmem:[%s3343_s8 + $0xa0] sm:$0xff]  ;;  %v571_v41 = vld [vmem:[%s3375_s26 + $0x38] sm:$0xff] }
  0x4c   : > { %2768 = vmatprep.subr.mxu0 %v557_v14  ;;  %2820 = vmatmul.mubr.msk.f32.gmra.mxu1 %vm794_vm1, %v785_v15  ;;  %v572_v42 = vld [vmem:[%s3375_s26 + $0x40] sm:$0xff]  ;;  %v2557_v43 = vld [vmem:[%s3343_s8 + $0xa8] sm:$0xff]  ;;  %v2558_v44 = vld [vmem:[%s3343_s8 + $0xb0] sm:$0xff] }
  0x4d   : > { %2769 = vmatpush3.msra.mxu0 %v557_v14  ;;  %2822 = vmatprep.mubr.msk.f32.mxu1 %vm794_vm1, %v786_v16  ;;  %v573_v45 = vld [vmem:[%s3375_s26 + $0x48] sm:$0xff]  ;;  %v574_v46 = vld [vmem:[%s3375_s26 + $0x50] sm:$0xff]  ;;  %v2559_v47 = vld [vmem:[%s3343_s8 + $0xb8] sm:$0xff] }
  0x4e   : > { %2770 = vmatprep.subr.mxu0 %v556_v17  ;;  %2890 = vmatprep.subr.mxu1 %v3323_v1  ;;  %v2560_v48 = vld [vmem:[%s3343_s8 + $0xc0] sm:$0xff]  ;;  %v575_v49 = vld [vmem:[%s3375_s26 + $0x58] sm:$0xff]  ;;  %v2561_v51 = vld [vmem:[%s3343_s8 + $0xc8] sm:$0xff] }
  0x4f   : > { %2771 = vmatpush3.msra.mxu0 %v556_v17  ;;  %v576_v50 = vld [vmem:[%s3375_s26 + $0x60] sm:$0xff]  ;;  %v2562_v52 = vld [vmem:[%s3343_s8 + $0xd0] sm:$0xff]  ;;  %v577_v53 = vld [vmem:[%s3375_s26 + $0x68] sm:$0xff] }
  0x50   : > { %2772 = vmatprep.subr.mxu0 %v555_v18  ;;  %2823 = vmatmul.mubr.msk.f32.gmra.mxu1 %vm794_vm1, %v787_v19  ;;  %v578_v54 = vld [vmem:[%s3375_s26 + $0x70] sm:$0xff]  ;;  %v2563_v55 = vld [vmem:[%s3343_s8 + $0xd8] sm:$0xff]  ;;  %v2564_v56 = vld [vmem:[%s3343_s8 + $0xe0] sm:$0xff] }
  0x51   : > { %2773 = vmatpush3.msra.mxu0 %v555_v18  ;;  %2825 = vmatprep.mubr.msk.f32.mxu1 %vm794_vm1, %v788_v20  ;;  %v579_v57 = vld [vmem:[%s3375_s26 + $0x78] sm:$0xff]  ;;  %v778_v58 = vld [vmem:[%s3343_s8] sm:$0xff]  ;;  %v2565_v59 = vld [vmem:[%s3343_s8 + $0xe8] sm:$0xff]  ;;  %s2514_s26 = sshll.u32 %s3329_s23, 7 }
  0x52   : > { %2774 = vmatprep.subr.mxu0 %v554_v21  ;;  %v2566_v60 = vld [vmem:[%s3343_s8 + $0xf0] sm:$0xff]  ;;  %v779_v61 = vld [vmem:[%s3343_s8 + $0x8] sm:$0xff]  ;;  %v2584_v62 = vld [vmem:[%s3343_s8 + $0x100] sm:$0xff]  ;;  %s3550_s10 = scalar_lea.vmem [#allocation3], %s2514_s26  ;;  %s3034_s26 = sshll.u32 %s3095_s22, 4  ;;  %s3035_s26 = int_to_ptr.vmem [resolvable:$false] %s3034_s26 }
  0x53   : > { %2775 = vmatpush3.msra.mxu0 %v554_v21  ;;  %v2567_v63 = vld [vmem:[%s3343_s8 + $0xf8] sm:$0xff]  ;;  %v2616_v0 = vld [vmem:[%s3343_s8 + $0x180] sm:$0xff]  ;;  %v2585_v2 = vld [vmem:[%s3343_s8 + $0x108] sm:$0xff]  ;;  %s2401_s14 = sshll.u32 %s3550_s10, 4  ;;  %s4326_s14 = int_to_ptr.vmem [resolvable:$true] %s2401_s14 }
  0x54   : > { %2776 = vmatprep.subr.mxu0 %v553_v22  ;;  %2826 = vmatmul.mubr.msk.f32.gmra.mxu1 %vm794_vm1, %v789_v23  ;;  %v2586_v4 = vld [vmem:[%s3343_s8 + $0x110] sm:$0xff]  ;;  %v2617_v5 = vld [vmem:[%s3343_s8 + $0x188] sm:$0xff]  ;;  %v2587_v6 = vld [vmem:[%s3343_s8 + $0x118] sm:$0xff]  ;;  %s3030_s7 = scalar_lea.vmem %s4326_s14, 2048  ;;  %p3037_p3 = scmp.lt.s32.totalorder %s4326_s14, %s3035_s26 }
  0x55   : > { %2777 = vmatpush3.msra.mxu0 %v553_v22  ;;  %2828 = vmatprep.mubr.msk.f32.mxu1 %vm794_vm1, %v790_v24  ;;  %v2588_v7 = vld [vmem:[%s3343_s8 + $0x120] sm:$0xff]  ;;  %v2589_v9 = vld [vmem:[%s3343_s8 + $0x128] sm:$0xff]  ;;  %v2590_v10 = vld [vmem:[%s3343_s8 + $0x130] sm:$0xff]  ;;  %p3031_p0 = scmp.ne.s32.totalorder %s4326_s14, %s3030_s7 }
  0x56   : > { %2778 = vmatprep.subr.mxu0 %v552_v25  ;;  %v2620_v8 = vld [vmem:[%s3343_s8 + $0x1a0] sm:$0xff]  ;;  %v2621_v11 = vld [vmem:[%s3343_s8 + $0x1a8] sm:$0xff]  ;;  %v2622_v12 = vld [vmem:[%s3343_s8 + $0x1b0] sm:$0xff] }
  0x57   : > { %2779 = vmatpush3.msra.mxu0 %v552_v25  ;;  %v2591_v13 = vld [vmem:[%s3343_s8 + $0x138] sm:$0xff]  ;;  %v2592_v15 = vld [vmem:[%s3343_s8 + $0x140] sm:$0xff]  ;;  %v2593_v17 = vld [vmem:[%s3343_s8 + $0x148] sm:$0xff]  ;;  %p3032_p1 = pnand %p3031_p0, %p3167_p6 }
  0x58   : > { %2780 = vmatprep.subr.mxu0 %v551_v26  ;;  %2829 = vmatmul.mubr.msk.f32.gmra.mxu1 %vm794_vm1, %v791_v27  ;;  %v2623_v14 = vld [vmem:[%s3343_s8 + $0x1b8] sm:$0xff]  ;;  %v2624_v16 = vld [vmem:[%s3343_s8 + $0x1c0] sm:$0xff]  ;;  %v2625_v18 = vld [vmem:[%s3343_s8 + $0x1c8] sm:$0xff] }
  0x59   : > { %2781 = vmatpush3.msra.mxu0 %v551_v26  ;;  %2831 = vmatprep.mubr.msk.f32.mxu1 %vm794_vm1, %v792_v28  ;;  %v2594_v19 = vld [vmem:[%s3343_s8 + $0x150] sm:$0xff]  ;;  %v2595_v21 = vld [vmem:[%s3343_s8 + $0x158] sm:$0xff]  ;;  %p3033_p2 = pneg %p3032_p1 }
  0x5a   : > { %2783 = vmatmul.mubr.msk.f32.vlgmr.msra.gmra.mxu0 %vm580_vm2, %v565_v29  ;;  %2806 = vmatprep.subr.mxu0 %v3323_v1  ;;  %v2626_v20 = vld [vmem:[%s3343_s8 + $0x1d0] sm:$0xff]  ;;  %v2627_v22 = vld [vmem:[%s3343_s8 + $0x1d8] sm:$0xff] }
  0x5b   : > { %2785 = vmatprep.mubr.msk.f32.mxu0 %vm580_vm2, %v566_v30  ;;  %2807 = vmatpush3.msra.mxu0 %v3323_v1 }
  0x5c   : > { %2832 = vmatmul.mubr.msk.f32.gmra.mxu1 %vm794_vm1, %v793_v31  ;;  %2808 = vmatprep.subr.mxu0 %v3335_v3 }
  0x5d   : > { %2838 = vmatprep.mubr.msk.f32.mxu1 %vm794_vm1, %v2552_v32  ;;  %2809 = vmatpush3.msra.mxu0 %v3335_v3 }
  0x5e   : > { %2786 = vmatmul.mubr.msk.f32.gmra.mxu0 %vm580_vm2, %v567_v33  ;;  %2862 = vmatprep.subr.mxu0 %v3323_v1 }
  0x5f   : > { %2788 = vmatprep.mubr.msk.f32.mxu0 %vm580_vm2, %v568_v34 }
  0x60   : > { %2839 = vmatmul.mubr.msk.f32.vlgmr.msra.gmra.mxu1 %vm794_vm1, %v2553_v35 }
  0x61   : > { %2841 = vmatprep.mubr.msk.f32.mxu1 %vm794_vm1, %v2554_v36  ;;  %2891 = vmatpush3.msra.mxu1 %v3323_v1 }
  0x62   : > { %2789 = vmatmul.mubr.msk.f32.gmra.mxu0 %vm580_vm2, %v569_v37  ;;  %2892 = vmatprep.subr.mxu1 %v3335_v3 }
  0x63   : > { %2791 = vmatprep.mubr.msk.f32.mxu0 %vm580_vm2, %v570_v38  ;;  %2893 = vmatpush3.msra.mxu1 %v3335_v3  ;;  %v2596_v38 = vld [vmem:[%s3343_s8 + $0x160] sm:$0xff] }
  0x64   : > { %2842 = vmatmul.mubr.msk.f32.gmra.mxu1 %vm794_vm1, %v2555_v39  ;;  %v2628_v39 = vld [vmem:[%s3343_s8 + $0x1e0] sm:$0xff] }
  0x65   : > { %2844 = vmatprep.mubr.msk.f32.mxu1 %vm794_vm1, %v2556_v40  ;;  %v2597_v40 = vld [vmem:[%s3343_s8 + $0x168] sm:$0xff] }
  0x66   : > { %2792 = vmatmul.mubr.msk.f32.gmra.mxu0 %vm580_vm2, %v571_v41  ;;  %v2629_v41 = vld [vmem:[%s3343_s8 + $0x1e8] sm:$0xff] }
  0x67   : > { %2794 = vmatprep.mubr.msk.f32.mxu0 %vm580_vm2, %v572_v42 }
  0x68   : > { %2845 = vmatmul.mubr.msk.f32.gmra.mxu1 %vm794_vm1, %v2557_v43 }
  0x69   : > { %2847 = vmatprep.mubr.msk.f32.mxu1 %vm794_vm1, %v2558_v44 }
  0x6a   : > { %2795 = vmatmul.mubr.msk.f32.gmra.mxu0 %vm580_vm2, %v573_v45 }
  0x6b   : > { %2797 = vmatprep.mubr.msk.f32.mxu0 %vm580_vm2, %v574_v46 }
  0x6c   : > { %2848 = vmatmul.mubr.msk.f32.gmra.mxu1 %vm794_vm1, %v2559_v47 }
  0x6d   : > { %2850 = vmatprep.mubr.msk.f32.mxu1 %vm794_vm1, %v2560_v48 }
  0x6e   : > { %2798 = vmatmul.mubr.msk.f32.gmra.mxu0 %vm580_vm2, %v575_v49 }
  0x6f   : > { %2800 = vmatprep.mubr.msk.f32.mxu0 %vm580_vm2, %v576_v50 }
  0x70   : > { %2851 = vmatmul.mubr.msk.f32.gmra.mxu1 %vm794_vm1, %v2561_v51 }
  0x71   : > { %2853 = vmatprep.mubr.msk.f32.mxu1 %vm794_vm1, %v2562_v52 }
  0x72   : > { %2801 = vmatmul.mubr.msk.f32.gmra.mxu0 %vm580_vm2, %v577_v53 }
  0x73   : > { %2803 = vmatprep.mubr.msk.f32.mxu0 %vm580_vm2, %v578_v54 }
  0x74   : > { %2854 = vmatmul.mubr.msk.f32.gmra.mxu1 %vm794_vm1, %v2563_v55 }
  0x75   : > { %2856 = vmatprep.mubr.msk.f32.mxu1 %vm794_vm1, %v2564_v56 }
  0x76   : > { %2804 = vmatmul.mubr.msk.f32.gmra.mxu0 %vm580_vm2, %v579_v57 }
  0x77   : > { %2810 = vmatprep.mubr.msk.f32.mxu0 %vm794_vm1, %v778_v58 }
  0x78   : > { %2857 = vmatmul.mubr.msk.f32.gmra.mxu1 %vm794_vm1, %v2565_v59 }
  0x79   : > { %2859 = vmatprep.mubr.msk.f32.mxu1 %vm794_vm1, %v2566_v60 }
  0x7a   : > { %2811 = vmatmul.mubr.msk.f32.vlgmr.msra.gmra.mxu0 %vm794_vm1, %v779_v61 }
  0x7b   : > { %2863 = vmatpush3.msra.mxu0 %v3323_v1  ;;  %2866 = vmatprep.mubr.msk.f32.mxu0 %vm794_vm1, %v2584_v62  ;;  %v2618_v1 = vld [vmem:[%s3343_s8 + $0x190] sm:$0xff] }
  0x7c   : > { %2860 = vmatmul.mubr.msk.f32.gmra.mxu1 %vm794_vm1, %v2567_v63  ;;  %2864 = vmatprep.subr.mxu0 %v3335_v3 }
  0x7d   : > { %2865 = vmatpush3.msra.mxu0 %v3335_v3  ;;  %2894 = vmatprep.mubr.msk.f32.mxu1 %vm794_vm1, %v2616_v0  ;;  %v2619_v3 = vld [vmem:[%s3343_s8 + $0x198] sm:$0xff] }
  0x7e   : > { %2867 = vmatmul.mubr.msk.f32.vlgmr.msra.gmra.mxu0 %vm794_vm1, %v2585_v2 }
  0x7f   : > { %2869 = vmatprep.mubr.msk.f32.mxu0 %vm794_vm1, %v2586_v4 }
  0x80   : > { %2895 = vmatmul.mubr.msk.f32.vlgmr.msra.gmra.mxu1 %vm794_vm1, %v2617_v5 }
  0x81   : > { %2897 = vmatprep.mubr.msk.f32.mxu1 %vm794_vm1, %v2618_v1 }
  0x82   : > { %2870 = vmatmul.mubr.msk.f32.gmra.mxu0 %vm794_vm1, %v2587_v6 }
  0x83   : > { %2872 = vmatprep.mubr.msk.f32.mxu0 %vm794_vm1, %v2588_v7 }
  0x84   : > { %2898 = vmatmul.mubr.msk.f32.gmra.mxu1 %vm794_vm1, %v2619_v3 }
  0x85   : > { %2900 = vmatprep.mubr.msk.f32.mxu1 %vm794_vm1, %v2620_v8 }
  0x86   : > { %2873 = vmatmul.mubr.msk.f32.gmra.mxu0 %vm794_vm1, %v2589_v9 }
  0x87   : > { %2875 = vmatprep.mubr.msk.f32.mxu0 %vm794_vm1, %v2590_v10 }
  0x88   : > { %2901 = vmatmul.mubr.msk.f32.gmra.mxu1 %vm794_vm1, %v2621_v11 }
  0x89   : > { %2903 = vmatprep.mubr.msk.f32.mxu1 %vm794_vm1, %v2622_v12 }
  0x8a   : > { %2876 = vmatmul.mubr.msk.f32.gmra.mxu0 %vm794_vm1, %v2591_v13 }
  0x8b   : > { %2878 = vmatprep.mubr.msk.f32.mxu0 %vm794_vm1, %v2592_v15 }
  0x8c   : > { %2904 = vmatmul.mubr.msk.f32.gmra.mxu1 %vm794_vm1, %v2623_v14 }
  0x8d   : > { %2906 = vmatprep.mubr.msk.f32.mxu1 %vm794_vm1, %v2624_v16 }
  0x8e   : > { %2879 = vmatmul.mubr.msk.f32.gmra.mxu0 %vm794_vm1, %v2593_v17 }
  0x8f   : > { %2881 = vmatprep.mubr.msk.f32.mxu0 %vm794_vm1, %v2594_v19  ;;  %v2598_v19 = vld [vmem:[%s3343_s8 + $0x170] sm:$0xff] }
  0x90   : > { %2907 = vmatmul.mubr.msk.f32.gmra.mxu1 %vm794_vm1, %v2625_v18  ;;  %v2630_v18 = vld [vmem:[%s3343_s8 + $0x1f0] sm:$0xff] }
  0x91   : > { %2909 = vmatprep.mubr.msk.f32.mxu1 %vm794_vm1, %v2626_v20  ;;  %v2599_v20 = vld [vmem:[%s3343_s8 + $0x178] sm:$0xff] }
  0x92   : > { %2882 = vmatmul.mubr.msk.f32.gmra.mxu0 %vm794_vm1, %v2595_v21  ;;  %v2631_v21 = vld [vmem:[%s3343_s8 + $0x1f8] sm:$0xff]  ;;  %s3093_s8 = smov 64  }
  0x93   : > { %2884 = vmatprep.mubr.msk.f32.mxu0 %vm794_vm1, %v2596_v38 }
  0x94   : > { %2910 = vmatmul.mubr.msk.f32.gmra.mxu1 %vm794_vm1, %v2627_v22 }
  0x95   : > { %2912 = vmatprep.mubr.msk.f32.mxu1 %vm794_vm1, %v2628_v39 }
  0x96   : > { %2885 = vmatmul.mubr.msk.f32.gmra.mxu0 %vm794_vm1, %v2597_v40 }
  0x97   : > { %2887 = vmatprep.mubr.msk.f32.mxu0 %vm794_vm1, %v2598_v19 }
  0x98   : > { %2913 = vmatmul.mubr.msk.f32.gmra.mxu1 %vm794_vm1, %v2629_v41 }
  0x99   : > { %2915 = vmatprep.mubr.msk.f32.mxu1 %vm794_vm1, %v2630_v18 }
  0x9a   : > { %2888 = vmatmul.mubr.msk.f32.gmra.mxu0 %vm794_vm1, %v2599_v20 }
  0x9c   : > { %2916 = vmatmul.mubr.msk.f32.gmra.mxu1 %vm794_vm1, %v2631_v21 }
 0x104   : > { %v3548_v23 = vpop.f32.mrf.mxu1 }
 0x105   : > { %992 = vst.msk [vmem:[%s3550_s10 + $0x18] sm:$0xff] %vm988_vm3, %v3548_v23 }
 0x106   : > { %v3555_v24 = vpop.f32.mrf.mxu1 }
 0x107   : > { %991 = vst.msk [vmem:[%s3550_s10 + $0x10] sm:$0xff] %vm988_vm3, %v3555_v24 }
 0x108   : > { %v2818_v25 = vpop.f32.mrf.mxu1 }
 0x109   : > { %994 = vst.msk [vmem:[%s3550_s10 + $0x28] sm:$0xff] %vm988_vm3, %v2818_v25 }
 0x10a   : > { %v3562_v26 = vpop.f32.mrf.mxu1 }
 0x10b   : > { %993 = vst.msk [vmem:[%s3550_s10 + $0x20] sm:$0xff] %vm988_vm3, %v3562_v26 }
 0x10c   : > { %v2821_v27 = vpop.f32.mrf.mxu1 }
 0x10d   : > { %996 = vst.msk [vmem:[%s3550_s10 + $0x38] sm:$0xff] %vm988_vm3, %v2821_v27 }
 0x10e   : > { %v939_v28 = vpop.f32.mrf.mxu1 }
 0x10f   : > { %995 = vst.msk [vmem:[%s3550_s10 + $0x30] sm:$0xff] %vm988_vm3, %v939_v28 }
 0x110   : > { %v3571_v29 = vpop.f32.mrf.mxu1 }
 0x111   : > { %998 = vst.msk [vmem:[%s3550_s10 + $0x48] sm:$0xff] %vm988_vm3, %v3571_v29 }
 0x112   : > { %v3576_v30 = vpop.f32.mrf.mxu1 }
 0x113   : > { %997 = vst.msk [vmem:[%s3550_s10 + $0x40] sm:$0xff] %vm988_vm3, %v3576_v30 }
 0x114   : > { %v3581_v31 = vpop.f32.mrf.mxu1 }
 0x115   : > { %1000 = vst.msk [vmem:[%s3550_s10 + $0x58] sm:$0xff] %vm988_vm3, %v3581_v31 }
 0x116   : > { %v3586_v32 = vpop.f32.mrf.mxu1 }
 0x117   : > { %999 = vst.msk [vmem:[%s3550_s10 + $0x50] sm:$0xff] %vm988_vm3, %v3586_v32 }
 0x118   : > { %v3591_v33 = vpop.f32.mrf.mxu1 }
 0x119   : > { %1002 = vst.msk [vmem:[%s3550_s10 + $0x68] sm:$0xff] %vm988_vm3, %v3591_v33 }
 0x11a   : > { %v3596_v34 = vpop.f32.mrf.mxu0  ;;  %v3598_v35 = vpop.f32.mrf.mxu1 }
 0x11b   : > { %1001 = vst.msk [vmem:[%s3550_s10 + $0x60] sm:$0xff] %vm988_vm3, %v3598_v35 }
 0x11c   : > { %v3603_v36 = vpop.f32.mrf.mxu0  ;;  %v3605_v37 = vpop.f32.mrf.mxu1 }
 0x11d   : > { %1004 = vst.msk [vmem:[%s3550_s10 + $0x78] sm:$0xff] %vm988_vm3, %v3605_v37 }
 0x11e   : > { %v3616_v42 = vpop.f32.mrf.mxu0  ;;  %v3618_v43 = vpop.f32.mrf.mxu1 }
 0x11f   : > { %1003 = vst.msk [vmem:[%s3550_s10 + $0x70] sm:$0xff] %vm988_vm3, %v3618_v43  ;;  %v1008_v5 = vmul.f32 %v3548_v23, %v3616_v42 }
 0x120   : > { %v3625_v44 = vpop.f32.mrf.mxu0  ;;  %v2840_v45 = vpop.f32.mrf.mxu1 }
 0x121   : > { %1297 = vrot.lane.b32.xlu1 %v2840_v45, %s3092_s11  ;;  %v1030_v3 = vsel %vm988_vm3, %v1008_v5, 0.0  ;;  %v1007_v8 = vmul.f32 %v3555_v24, %v3625_v44  ;;  %v1361_v11 = vmul.f32 %v2840_v45, %v3596_v34 }
 0x122   : > { %v3628_v46 = vpop.f32.mrf.mxu0  ;;  %v1200_v47 = vpop.f32.mrf.mxu1 }
 0x123   : > { %1295 = vrot.lane.b32.xlu0 %v1200_v47, %s3092_s11  ;;  %v1010_v48 = vmul.f32 %v2818_v25, %v3628_v46  ;;  %v1360_v2 = vmul.f32 %v1200_v47, %v3603_v36  ;;  %v1027_v13 = vsel %vm988_vm3, %v1007_v8, 0.0  ;;  %v1379_v16 = vsel %vm988_vm3, %v1361_v11, 0.0 }
 0x124   : > { %v3632_v49 = vpop.f32.mrf.mxu0  ;;  %v2843_v7 = vpop.f32.mrf.mxu1 }
 0x125   : > { %v1376_v1 = vsel %vm988_vm3, %v1360_v2, 0.0  ;;  %v1009_v6 = vmul.f32 %v3562_v26, %v3632_v49  ;;  %v1363_v9 = vmul.f32 %v2843_v7, %v3616_v42  ;;  %v1036_v24 = vsel %vm988_vm3, %v1010_v48, 0.0 }
 0x126   : > { %v3634_v50 = vpop.f32.mrf.mxu0  ;;  %v1210_v12 = vpop.f32.mrf.mxu1 }
 0x127   : > { %v3637_v51 = vmul.f32 %v2821_v27, %v3634_v50  ;;  %v1033_v10 = vsel %vm988_vm3, %v1009_v6, 0.0  ;;  %v1362_v14 = vmul.f32 %v1210_v12, %v3625_v44  ;;  %v1385_v15 = vsel %vm988_vm3, %v1363_v9, 0.0 }
 0x128   : > { %v3639_v52 = vpop.f32.mrf.mxu0  ;;  %v2846_v22 = vpop.f32.mrf.mxu1 }
 0x129   : > { %v1011_v53 = vmul.f32 %v939_v28, %v3639_v52  ;;  %v1382_v17 = vsel %vm988_vm3, %v1362_v14, 0.0  ;;  %v1365_v45 = vmul.f32 %v2846_v22, %v3628_v46  ;;  %v1042_v47 = vsel %vm988_vm3, %v3637_v51, 0.0 }
 0x12a   : > { %v3642_v54 = vpop.f32.mrf.mxu0  ;;  %v1220_v23 = vpop.f32.mrf.mxu1 }
 0x12b   : > { %v1364_v25 = vmul.f32 %v1220_v23, %v3632_v49  ;;  %v1039_v26 = vsel %vm988_vm3, %v1011_v53, 0.0  ;;  %v1014_v11 = vmul.f32 %v3571_v29, %v3642_v54 }
 0x12c   : > { %v3644_v55 = vpop.f32.mrf.mxu0  ;;  %v2849_v39 = vpop.f32.mrf.mxu1 }
 0x12d   : > { %v1388_v27 = vsel %vm988_vm3, %v1364_v25, 0.0  ;;  %v1013_v41 = vmul.f32 %v3576_v30, %v3644_v55  ;;  %v1048_v14 = vsel %vm988_vm3, %v1014_v11, 0.0 }
 0x12e   : > { %v3646_v56 = vpop.f32.mrf.mxu0  ;;  %v1230_v40 = vpop.f32.mrf.mxu1 }
 0x12f   : > { %v1366_v48 = vmul.f32 %v1230_v40, %v3639_v52  ;;  %v1045_v53 = vsel %vm988_vm3, %v1013_v41, 0.0  ;;  %v1016_v25 = vmul.f32 %v3581_v31, %v3646_v56 }
 0x130   : > { %v3648_v57 = vpop.f32.mrf.mxu0  ;;  %v2852_v51 = vpop.f32.mrf.mxu1 }
 0x132   : > { %v3650_v58 = vpop.f32.mrf.mxu0 }
 0x134   : > { %v3652_v59 = vpop.f32.mrf.mxu0 }
 0x136   : > { %v3654_v60 = vpop.f32.mrf.mxu0 }
 0x138   : > { %v3656_v61 = vpop.f32.mrf.mxu0 }
 0x13a   : > { %v2812_v62 = vpop.f32.mrf.mxu0 }
 0x13b   : > { %990 = vst.msk [vmem:[%s3550_s10 + $0x8] sm:$0xff] %vm988_vm3, %v2812_v62  ;;  %v3661_v63 = vmul.f32 %v2812_v62, %v3596_v34  ;;  %v1391_v62 = vsel %vm988_vm3, %v1365_v45, 0.0 }
 0x13c   : > { %v909_v0 = vpop.f32.mrf.mxu0 }
 0x13d   : > { %989 = vst.msk [vmem:[%s3550_s10] sm:$0xff] %vm988_vm3, %v909_v0  ;;  %v3667_v4 = vmul.f32 %v909_v0, %v3603_v36  ;;  %v1394_v0 = vsel %vm988_vm3, %v1366_v48, 0.0 }
 0x142   : > { %1377 = vadd.xlane.f32.xlu0 %v1376_v1 }
 0x145   : > { %1031 = vadd.xlane.f32.xlu1 %v1030_v3 }
 0x146   : > { %1034 = vadd.xlane.f32.xlu0 %v1033_v10 }
 0x149   : > { %1028 = vadd.xlane.f32.xlu1 %v1027_v13  ;;  %v1367_v13 = vmul.f32 %v2849_v39, %v3634_v50 }
 0x14a   : > { %1386 = vadd.xlane.f32.xlu0 %v1385_v15 }
 0x14d   : > { %1380 = vadd.xlane.f32.xlu1 %v1379_v16 }
 0x14e   : > { %1383 = vadd.xlane.f32.xlu0 %v1382_v17  ;;  %v1397_v17 = vsel %vm988_vm3, %v1367_v13, 0.0 }
 0x15e   : > { %1301 = vrot.lane.b32.xlu1 %v2843_v7, %s3092_s11  ;;  %v1240_v7 = vpop.f32.mrf.mxu1 }
 0x15f   : > { %v1368_v15 = vmul.f32 %v1240_v7, %v3644_v55 }
 0x161   : > { %v1400_v29 = vsel %vm988_vm3, %v1368_v15, 0.0 }
 0x164   : > { %1303 = vrot.lane.b32.xlu0 %v1220_v23, %s3092_s11 }
 0x182   : > { %1037 = vadd.xlane.f32.xlu1 %v1036_v24 }
 0x183   : > { %1040 = vadd.xlane.f32.xlu0 %v1039_v26  ;;  %v1017_v26 = vmul.f32 %v3598_v35, %v3652_v59 }
 0x187   : > { %1389 = vadd.xlane.f32.xlu0 %v1388_v27  ;;  %v1369_v27 = vmul.f32 %v2852_v51, %v3642_v54 }
 0x193   : > { %1299 = vrot.lane.b32.xlu1 %v1210_v12, %s3092_s11  ;;  %v1298_v28 = vpop.permute.xlu1 %1297  ;;  %v1015_v12 = vmul.f32 %v3586_v32, %v3648_v57  ;;  %v2855_v32 = vpop.f32.mrf.mxu1 }
 0x194   : > { %1345 = vst.msk [vmem:[%s3550_s10 + $0x8] sm:$0xff] %vm1343_vm4, %v1298_v28  ;;  %v1054_v28 = vsel %vm988_vm3, %v1016_v25, 0.0 }
 0x195   : > { %v1296_v38 = vpop.permute.xlu0 %1295  ;;  %v1051_v16 = vsel %vm988_vm3, %v1015_v12, 0.0  ;;  %v1250_v20 = vpop.f32.mrf.mxu1 }
 0x196   : > { %1344 = vst.msk [vmem:[%s3550_s10] sm:$0xff] %vm1343_vm4, %v1296_v38  ;;  %v1370_v38 = vmul.f32 %v1250_v20, %v3648_v57 }
 0x197   : > { %1305 = vrot.lane.b32.xlu1 %v2846_v22, %s3092_s11  ;;  %v2858_v35 = vpop.f32.mrf.mxu1 }
 0x198   : > { %v1406_v31 = vsel %vm988_vm3, %v1370_v38, 0.0 }
 0x19d   : > { %1307 = vrot.lane.b32.xlu0 %v1230_v40, %s3092_s11  ;;  %v1403_v40 = vsel %vm988_vm3, %v1369_v27, 0.0  ;;  %v2868_v27 = vpop.f32.mrf.mxu0 }
 0x19f   : > { %v1555_v38 = vpop.f32.mrf.mxu0 }
 0x1bb   : > { %1043 = vadd.xlane.f32.xlu1 %v1042_v47  ;;  %v1260_v47 = vpop.f32.mrf.mxu1 }
 0x1bc   : > { %1046 = vadd.xlane.f32.xlu0 %v1045_v53  ;;  %v1372_v13 = vmul.f32 %v1260_v47, %v3652_v59 }
 0x1bf   : > { %1392 = vadd.xlane.f32.xlu1 %v1391_v62 }
 0x1c0   : > { %1395 = vadd.xlane.f32.xlu0 %v1394_v0 }
 0x1cb   : > { %v3715_v30 = vpop.xlane.xlu0 %1377 }
 0x1ce   : > { %v3717_v2 = vpop.xlane.xlu1 %1031 }
 0x1cf   : > { %v3719_v5 = vpop.xlane.xlu0 %1034 }
 0x1d0   : > { %1309 = vrot.lane.b32.xlu1 %v2849_v39, %s3092_s11  ;;  %v1057_v39 = vsel %vm988_vm3, %v1017_v26, 0.0  ;;  %v1021_v26 = vsel %vm988_vm3, %v3667_v4, 0.0 }
 0x1d2   : > { %v3722_v1 = vpop.xlane.xlu1 %1028 }
 0x1d3   : > { %v3724_v6 = vpop.xlane.xlu0 %1386 }
 0x1d6   : > { %v3726_v3 = vpop.xlane.xlu1 %1380  ;;  %1311 = vrot.lane.b32.xlu0 %v1240_v7, %s3092_s11  ;;  %v1019_v7 = vmul.f32 %v3618_v43, %v3656_v61  ;;  %v1412_v43 = vsel %vm988_vm3, %v1372_v13, 0.0 }
 0x1d7   : > { %v3729_v8 = vpop.xlane.xlu0 %1383 }
 0x1d8   : > { %v1063_v11 = vsel %vm988_vm3, %v1019_v7, 0.0 }
 0x1da   : > { %v1302_v9 = vpop.permute.xlu1 %1301 }
 0x1db   : > { %1347 = vst.msk [vmem:[%s3550_s10 + $0x18] sm:$0xff] %vm1343_vm4, %v1302_v9  ;;  %v1304_v10 = vpop.permute.xlu0 %1303  ;;  %v1371_v9 = vmul.f32 %v2855_v32, %v3646_v56 }
 0x1dc   : > { %1348 = vst.msk [vmem:[%s3550_s10 + $0x20] sm:$0xff] %vm1343_vm4, %v1304_v10 }
 0x1dd   : > { %v1409_v12 = vsel %vm988_vm3, %v1371_v9, 0.0 }
 0x1f4   : > { %1049 = vadd.xlane.f32.xlu1 %v1048_v14 }
 0x1f5   : > { %1052 = vadd.xlane.f32.xlu0 %v1051_v16  ;;  %v2861_v16 = vpop.f32.mrf.mxu1 }
 0x1f8   : > { %1398 = vadd.xlane.f32.xlu1 %v1397_v17 }
 0x1f9   : > { %1401 = vadd.xlane.f32.xlu0 %v1400_v29 }
 0x209   : > { %1313 = vrot.lane.b32.xlu1 %v2852_v51, %s3092_s11  ;;  %v1018_v51 = vmul.f32 %v3591_v33, %v3650_v58  ;;  %v1024_v33 = vsel %vm988_vm3, %v3661_v63, 0.0 }
 0x20b   : > { %v3746_v18 = vpop.xlane.xlu1 %1037  ;;  %v1060_v10 = vsel %vm988_vm3, %v1018_v51, 0.0 }
 0x20c   : > { %v3748_v19 = vpop.xlane.xlu0 %1040 }
 0x20f   : > { %v1300_v21 = vpop.permute.xlu1 %1299  ;;  %1315 = vrot.lane.b32.xlu0 %v1250_v20, %s3092_s11 }
 0x210   : > { %1346 = vst.msk [vmem:[%s3550_s10 + $0x10] sm:$0xff] %vm1343_vm4, %v1300_v21  ;;  %v3753_v22 = vpop.xlane.xlu0 %1389  ;;  %v1020_v21 = vmul.f32 %v3605_v37, %v3654_v60 }
 0x213   : > { %v1306_v23 = vpop.permute.xlu1 %1305 }
 0x214   : > { %1349 = vst.msk [vmem:[%s3550_s10 + $0x28] sm:$0xff] %vm1343_vm4, %v1306_v23  ;;  %v1308_v24 = vpop.permute.xlu0 %1307  ;;  %v1373_v23 = vmul.f32 %v2858_v35, %v3650_v58 }
 0x215   : > { %1350 = vst.msk [vmem:[%s3550_s10 + $0x30] sm:$0xff] %vm1343_vm4, %v1308_v24  ;;  %v1066_v24 = vsel %vm988_vm3, %v1020_v21, 0.0 }
 0x216   : > { %v1415_v25 = vsel %vm988_vm3, %v1373_v23, 0.0 }
 0x22d   : > { %1055 = vadd.xlane.f32.xlu1 %v1054_v28 }
 0x22e   : > { %1058 = vadd.xlane.f32.xlu0 %v1057_v39 }
 0x231   : > { %1404 = vadd.xlane.f32.xlu1 %v1403_v40 }
 0x232   : > { %1407 = vadd.xlane.f32.xlu0 %v1406_v31 }
 0x242   : > { %1317 = vrot.lane.b32.xlu1 %v2855_v32, %s3092_s11  ;;  %v1270_v32 = vpop.f32.mrf.mxu1 }
 0x244   : > { %v3770_v41 = vpop.xlane.xlu1 %1043  ;;  %v2896_v51 = vpop.f32.mrf.mxu1 }
 0x245   : > { %v3772_v45 = vpop.xlane.xlu0 %1046 }
 0x246   : > { %v1910_v7 = vpop.f32.mrf.mxu1 }
 0x248   : > { %v3774_v48 = vpop.xlane.xlu1 %1392  ;;  %1319 = vrot.lane.b32.xlu0 %v1260_v47, %s3092_s11  ;;  %v1375_v47 = vmul.f32 %v2861_v16, %v3654_v60 }
 0x249   : > { %v3777_v53 = vpop.xlane.xlu0 %1395 }
 0x24c   : > { %v1310_v62 = vpop.permute.xlu1 %1309 }
 0x24d   : > { %1351 = vst.msk [vmem:[%s3550_s10 + $0x38] sm:$0xff] %vm1343_vm4, %v1310_v62  ;;  %v1312_v0 = vpop.permute.xlu0 %1311 }
 0x24e   : > { %1352 = vst.msk [vmem:[%s3550_s10 + $0x40] sm:$0xff] %vm1343_vm4, %v1312_v0  ;;  %v1421_v0 = vsel %vm988_vm3, %v1375_v47, 0.0 }
 0x266   : > { %1061 = vadd.xlane.f32.xlu1 %v1060_v10 }
 0x267   : > { %1064 = vadd.xlane.f32.xlu0 %v1063_v11 }
 0x26a   : > { %1410 = vadd.xlane.f32.xlu1 %v1409_v12 }
 0x26b   : > { %1025 = vadd.xlane.f32.xlu0 %v1024_v33 }
 0x26f   : > { %1413 = vadd.xlane.f32.xlu0 %v1412_v43 }
 0x27b   : > { %1321 = vrot.lane.b32.xlu1 %v2858_v35, %s3092_s11  ;;  %v1374_v35 = vmul.f32 %v1270_v32, %v3656_v61 }
 0x27d   : > { %v3796_v14 = vpop.xlane.xlu1 %1049  ;;  %v1418_v62 = vsel %vm988_vm3, %v1374_v35, 0.0 }
 0x27e   : > { %v3798_v15 = vpop.xlane.xlu0 %1052 }
 0x281   : > { %v3800_v17 = vpop.xlane.xlu1 %1398 }
 0x282   : > { %v3802_v29 = vpop.xlane.xlu0 %1401 }
 0x285   : > { %v1314_v20 = vpop.permute.xlu1 %1313  ;;  %1323 = vrot.lane.b32.xlu0 %v1270_v32, %s3092_s11  ;;  %v1716_v32 = vmul.f32 %v2868_v27, %v3596_v34 }
 0x286   : > { %1353 = vst.msk [vmem:[%s3550_s10 + $0x48] sm:$0xff] %vm1343_vm4, %v1314_v20  ;;  %v1316_v63 = vpop.permute.xlu0 %1315  ;;  %v2070_v20 = vmul.f32 %v1910_v7, %v3603_v36 }
 0x287   : > { %1354 = vst.msk [vmem:[%s3550_s10 + $0x50] sm:$0xff] %vm1343_vm4, %v1316_v63  ;;  %v1734_v21 = vsel %vm988_vm3, %v1716_v32, 0.0 }
 0x288   : > { %v2086_v23 = vsel %vm988_vm3, %v2070_v20, 0.0 }
 0x29f   : > { %1067 = vadd.xlane.f32.xlu1 %v1066_v24  ;;  %v2871_v24 = vpop.f32.mrf.mxu0 }
 0x2a1   : > { %v1565_v47 = vpop.f32.mrf.mxu0 }
 0x2a3   : > { %1416 = vadd.xlane.f32.xlu1 %v1415_v25  ;;  %v2899_v25 = vpop.f32.mrf.mxu1 }
 0x2a4   : > { %1022 = vadd.xlane.f32.xlu0 %v1021_v26 }
 0x2a5   : > { %v1920_v26 = vpop.f32.mrf.mxu1 }
 0x2b4   : > { %1325 = vrot.lane.b32.xlu1 %v2861_v16, %s3092_s11  ;;  %v1715_v16 = vmul.f32 %v1555_v38, %v3603_v36  ;;  %s3036_s11 = scalar_lea.vmem %s3035_s26, 4096 }
 0x2b5   : > { %p3038_p4 = scmp.lt.s32.totalorder %s3036_s11, %s3030_s7 }
 0x2b6   : > { %v3817_v28 = vpop.xlane.xlu1 %1055  ;;  %v1731_v63 = vsel %vm988_vm3, %v1715_v16, 0.0 }
 0x2b7   : > { %v3819_v37 = vpop.xlane.xlu0 %1058  ;;  %p3039_p5 = por %p3038_p4, %p3037_p3 }
 0x2b8   : > { %1652 = vrot.lane.b32.xlu1 %v2868_v27, %s3093_s8 }
 0x2b9   : > { %p3040_p7 = pnand %p3039_p5, %p3033_p2 }
 0x2ba   : > { %v3822_v39 = vpop.xlane.xlu1 %1404  ;;  %1650 = vrot.lane.b32.xlu0 %v1555_v38, %s3093_s8 }
 0x2bb   : > { %v3825_v40 = vpop.xlane.xlu0 %1407 }
 0x2be   : > { %v1318_v31 = vpop.permute.xlu1 %1317 }
 0x2bf   : > { %1355 = vst.msk [vmem:[%s3550_s10 + $0x58] sm:$0xff] %vm1343_vm4, %v1318_v31  ;;  %v1320_v4 = vpop.permute.xlu0 %1319 }
 0x2c0   : > { %1356 = vst.msk [vmem:[%s3550_s10 + $0x60] sm:$0xff] %vm1343_vm4, %v1320_v4 }
 0x2d9   : > { %1419 = vadd.xlane.f32.xlu0 %v1418_v62  ;;  %v2071_v62 = vmul.f32 %v2896_v51, %v3596_v34 }
 0x2dc   : > { %1422 = vadd.xlane.f32.xlu1 %v1421_v0  ;;  %v1717_v0 = vmul.f32 %v1565_v47, %v3625_v44 }
 0x2ed   : > { %2007 = vrot.lane.b32.xlu1 %v2896_v51, %s3094_s12 }
 0x2ef   : > { %v3836_v9 = vpop.xlane.xlu1 %1061  ;;  %2005 = vrot.lane.b32.xlu0 %v1910_v7, %s3094_s12  ;;  %v2089_v7 = vsel %vm988_vm3, %v2071_v62, 0.0 }
 0x2f0   : > { %v3839_v10 = vpop.xlane.xlu0 %1064 }
 0x2f3   : > { %v3841_v11 = vpop.xlane.xlu1 %1410 }
 0x2f4   : > { %v3843_v12 = vpop.xlane.xlu0 %1025 }
 0x2f7   : > { %v1322_v13 = vpop.permute.xlu1 %1321 }
 0x2f8   : > { %1357 = vst.msk [vmem:[%s3550_s10 + $0x68] sm:$0xff] %vm1343_vm4, %v1322_v13  ;;  %v3847_v33 = vpop.xlane.xlu0 %1413  ;;  %v1737_v13 = vsel %vm988_vm3, %v1717_v0, 0.0 }
 0x2fc   : > { %v1324_v43 = vpop.permute.xlu0 %1323 }
 0x2fd   : > { %1358 = vst.msk [vmem:[%s3550_s10 + $0x70] sm:$0xff] %vm1343_vm4, %v1324_v43  ;;  %v2874_v43 = vpop.f32.mrf.mxu0 }
 0x2ff   : > { %v1575_v16 = vpop.f32.mrf.mxu0 }
 0x30e   : > { %1732 = vadd.xlane.f32.xlu0 %v1731_v63  ;;  %v2072_v63 = vmul.f32 %v1920_v26, %v3625_v44 }
 0x311   : > { %1735 = vadd.xlane.f32.xlu1 %v1734_v21  ;;  %v1718_v21 = vmul.f32 %v2871_v24, %v3616_v42 }
 0x312   : > { %2087 = vadd.xlane.f32.xlu0 %v2086_v23  ;;  %v2092_v23 = vsel %vm988_vm3, %v2072_v63, 0.0 }
 0x322   : > { %1656 = vrot.lane.b32.xlu1 %v2871_v24, %s3093_s8 }
 0x328   : > { %v3858_v27 = vpop.xlane.xlu1 %1067  ;;  %2009 = vrot.lane.b32.xlu0 %v1920_v26, %s3094_s12 }
 0x32c   : > { %v3861_v36 = vpop.xlane.xlu1 %1416 }
 0x32d   : > { %v1023_v38 = vpop.xlane.xlu0 %1022 }
 0x32e   : > { %v2135_v44 = vsel %vm2134_vm8, %v1023_v38, %v3715_v30  ;;  %v2877_v38 = vpop.f32.mrf.mxu0 }
 0x330   : > { %v1326_v31 = vpop.permute.xlu1 %1325  ;;  %v1585_v63 = vpop.f32.mrf.mxu0 }
 0x331   : > { %1359 = vst.msk [vmem:[%s3550_s10 + $0x78] sm:$0xff] %vm1343_vm4, %v1326_v31  ;;  %v1651_v4 = vpop.permute.xlu0 %1650  ;;  %v1740_v31 = vsel %vm988_vm3, %v1718_v21, 0.0 }
 0x332   : > { %1699 = vst.msk [vmem:[%s3550_s10] sm:$0xff] %vm1698_vm5, %v1651_v4  ;;  %v2902_v4 = vpop.f32.mrf.mxu1 }
 0x334   : > { %v1653_v35 = vpop.permute.xlu1 %1652 }
 0x335   : > { %1700 = vst.msk [vmem:[%s3550_s10 + $0x8] sm:$0xff] %vm1698_vm5, %v1653_v35  ;;  %v1930_v35 = vpop.f32.mrf.mxu1 }
 0x346   : > { %2090 = vadd.xlane.f32.xlu1 %v2089_v7 }
 0x347   : > { %1738 = vadd.xlane.f32.xlu0 %v1737_v13  ;;  %v1719_v13 = vmul.f32 %v1575_v16, %v3632_v49 }
 0x357   : > { %1654 = vrot.lane.b32.xlu1 %v1565_v47, %s3093_s8 }
 0x35b   : > { %2011 = vrot.lane.b32.xlu1 %v2899_v25, %s3094_s12 }
 0x35d   : > { %1658 = vrot.lane.b32.xlu0 %v1575_v16, %s3093_s8 }
 0x362   : > { %v3876_v32 = vpop.xlane.xlu0 %1419 }
 0x365   : > { %v3878_v34 = vpop.xlane.xlu1 %1422 }
 0x366   : > { %v2006_v51 = vpop.permute.xlu0 %2005 }
 0x367   : > { %2054 = vst.msk [vmem:[%s3550_s10] sm:$0xff] %vm2053_vm6, %v2006_v51  ;;  %v2073_v51 = vmul.f32 %v2899_v25, %v3616_v42  ;;  %v2136_v42 = vsel %vm2134_vm8, %v3843_v12, %v3726_v3  ;;  %v2074_v3 = vmul.f32 %v1930_v35, %v3632_v49  ;;  %v1720_v12 = vmul.f32 %v2874_v43, %v3628_v46 }
 0x368   : > { %v2137_v49 = vsel %vm2134_vm8, %v3722_v1, %v3729_v8 }
 0x369   : > { %v2008_v20 = vpop.permute.xlu1 %2007  ;;  %v2095_v30 = vsel %vm988_vm3, %v2073_v51, 0.0 }
 0x36a   : > { %2055 = vst.msk [vmem:[%s3550_s10 + $0x8] sm:$0xff] %vm2053_vm6, %v2008_v20  ;;  %v1743_v20 = vsel %vm988_vm3, %v1719_v13, 0.0 }
 0x37c   : > { %2093 = vadd.xlane.f32.xlu0 %v2092_v23 }
 0x37f   : > { %1741 = vadd.xlane.f32.xlu1 %v1740_v31 }
 0x390   : > { %1660 = vrot.lane.b32.xlu1 %v2874_v43, %s3093_s8 }
 0x392   : > { %2013 = vrot.lane.b32.xlu0 %v1930_v35, %s3094_s12 }
 0x397   : > { %v1733_v26 = vpop.xlane.xlu0 %1732 }
 0x398   : > { %v2152_v24 = vsel %vm2151_vm7, %v2135_v44, %v1733_v26 }
 0x39a   : > { %v1736_v47 = vpop.xlane.xlu1 %1735 }
 0x39b   : > { %v2088_v62 = vpop.xlane.xlu0 %2087  ;;  %v2153_v25 = vsel %vm2151_vm7, %v2136_v42, %v1736_v47  ;;  %v2098_v47 = vsel %vm988_vm3, %v2074_v3, 0.0  ;;  %v1721_v42 = vmul.f32 %v1585_v63, %v3639_v52 }
 0x39c   : > { %v3894_v0 = vsel %vm2168_vm9, %v2152_v24, %v2088_v62  ;;  %v1746_v62 = vsel %vm988_vm3, %v1720_v12, 0.0 }
 0x39d   : > { %v1749_v1 = vsel %vm988_vm3, %v1721_v42, 0.0 }
 0x39e   : > { %v1657_v7 = vpop.permute.xlu1 %1656 }
 0x39f   : > { %1702 = vst.msk [vmem:[%s3550_s10 + $0x18] sm:$0xff] %vm1698_vm5, %v1657_v7  ;;  %v2010_v21 = vpop.permute.xlu0 %2009  ;;  %v2905_v7 = vpop.f32.mrf.mxu1 }
 0x3a1   : > { %v1940_v13 = vpop.f32.mrf.mxu1 }
 0x3a2   : > { %v2076_v12 = vmul.f32 %v1940_v13, %v3639_v52  ;;  %v2139_v52 = vsel %vm2134_vm8, %v3719_v5, %v3753_v22 }
 0x3b1   : > { %1744 = vadd.xlane.f32.xlu0 %v1743_v20 }
 0x3b4   : > { %2096 = vadd.xlane.f32.xlu1 %v2095_v30 }
 0x3c5   : > { %2015 = vrot.lane.b32.xlu1 %v2902_v4, %s3094_s12 }
 0x3c7   : > { %1662 = vrot.lane.b32.xlu0 %v1585_v63, %s3093_s8  ;;  %v2138_v63 = vsel %vm2134_vm8, %v3717_v2, %v3724_v6  ;;  %v2104_v2 = vsel %vm988_vm3, %v2076_v12, 0.0 }
 0x3cf   : > { %v2091_v16 = vpop.xlane.xlu1 %2090 }
 0x3d0   : > { %v3909_v23 = vsel %vm2168_vm9, %v2153_v25, %v2091_v16  ;;  %v1739_v31 = vpop.xlane.xlu0 %1738  ;;  %v2075_v25 = vmul.f32 %v2902_v4, %v3628_v46  ;;  %v2880_v16 = vpop.f32.mrf.mxu0 }
 0x3d1   : > { %v2154_v35 = vsel %vm2151_vm7, %v2137_v49, %v1739_v31  ;;  %v1724_v22 = vmul.f32 %v2880_v16, %v3642_v54 }
 0x3d2   : > { %v2101_v8 = vsel %vm988_vm3, %v2075_v25, 0.0  ;;  %v1595_v31 = vpop.f32.mrf.mxu0  ;;  %v3972_v25 = vpop.f32.mrf.mxu1 }
 0x3d3   : > { %v1655_v44 = vpop.permute.xlu1 %1654 }
 0x3d4   : > { %1701 = vst.msk [vmem:[%s3550_s10 + $0x10] sm:$0xff] %vm1698_vm5, %v1655_v44  ;;  %v1659_v26 = vpop.permute.xlu0 %1658 }
 0x3d5   : > { %2056 = vst.msk [vmem:[%s3550_s10 + $0x10] sm:$0xff] %vm2053_vm6, %v2010_v21 }
 0x3d6   : > { %1703 = vst.msk [vmem:[%s3550_s10 + $0x20] sm:$0xff] %vm1698_vm5, %v1659_v26 }
 0x3d7   : > { %v2012_v24 = vpop.permute.xlu1 %2011 }
 0x3d8   : > { %2057 = vst.msk [vmem:[%s3550_s10 + $0x18] sm:$0xff] %vm2053_vm6, %v2012_v24 }
 0x3e6   : > { %2099 = vadd.xlane.f32.xlu0 %v2098_v47  ;;  %v1722_v47 = vmul.f32 %v2877_v38, %v3634_v50 }
 0x3e8   : > { %v1752_v6 = vsel %vm988_vm3, %v1722_v47, 0.0 }
 0x3e9   : > { %1747 = vadd.xlane.f32.xlu1 %v1746_v62  ;;  %v1723_v62 = vmul.f32 %v1595_v31, %v3644_v55 }
 0x3eb   : > { %v1755_v49 = vsel %vm988_vm3, %v1723_v62, 0.0 }
 0x3fa   : > { %1664 = vrot.lane.b32.xlu1 %v2877_v38, %s3093_s8 }
 0x3fc   : > { %2017 = vrot.lane.b32.xlu0 %v1940_v13, %s3094_s12 }
 0x405   : > { %v2094_v43 = vpop.xlane.xlu0 %2093 }
 0x406   : > { %v3930_v51 = vsel %vm2168_vm9, %v2154_v35, %v2094_v43  ;;  %v2883_v35 = vpop.f32.mrf.mxu0 }
 0x408   : > { %v1742_v20 = vpop.xlane.xlu1 %1741  ;;  %v1605_v43 = vpop.f32.mrf.mxu0 }
 0x409   : > { %v2014_v30 = vpop.permute.xlu0 %2013  ;;  %v2155_v46 = vsel %vm2151_vm7, %v2138_v63, %v1742_v20 }
 0x40a   : > { %2058 = vst.msk [vmem:[%s3550_s10 + $0x20] sm:$0xff] %vm2053_vm6, %v2014_v30 }
 0x40c   : > { %v1661_v21 = vpop.permute.xlu1 %1660 }
 0x40d   : > { %1704 = vst.msk [vmem:[%s3550_s10 + $0x28] sm:$0xff] %vm1698_vm5, %v1661_v21 }
 0x41b   : > { %1750 = vadd.xlane.f32.xlu0 %v1749_v1  ;;  %v3974_v1 = vpop.f32.mrf.mxu1 }
 0x41c   : > { %v2078_v5 = vmul.f32 %v3974_v1, %v3644_v55  ;;  %v2886_v55 = vpop.f32.mrf.mxu0 }
 0x41e   : > { %2102 = vadd.xlane.f32.xlu1 %v2101_v8  ;;  %v2077_v8 = vmul.f32 %v2905_v7, %v3634_v50  ;;  %v2110_v63 = vsel %vm988_vm3, %v2078_v5, 0.0 }
 0x42f   : > { %2019 = vrot.lane.b32.xlu1 %v2905_v7, %s3094_s12  ;;  %v1615_v7 = vpop.f32.mrf.mxu0 }
 0x431   : > { %1666 = vrot.lane.b32.xlu0 %v1595_v31, %s3093_s8  ;;  %v2107_v31 = vsel %vm988_vm3, %v2077_v8, 0.0 }
 0x43a   : > { %v1745_v44 = vpop.xlane.xlu0 %1744 }
 0x43b   : > { %v2156_v38 = vsel %vm2151_vm7, %v2139_v52, %v1745_v44  ;;  %v1725_v44 = vmul.f32 %v1605_v43, %v3648_v57  ;;  %v1727_v52 = vmul.f32 %v1615_v7, %v3652_v59 }
 0x43d   : > { %v2097_v4 = vpop.xlane.xlu1 %2096  ;;  %v1761_v50 = vsel %vm988_vm3, %v1725_v44, 0.0 }
 0x43e   : > { %v3947_v26 = vsel %vm2168_vm9, %v2155_v46, %v2097_v4  ;;  %v1663_v24 = vpop.permute.xlu0 %1662  ;;  %v1758_v46 = vsel %vm988_vm3, %v1724_v22, 0.0  ;;  %v2140_v4 = vsel %vm2134_vm8, %v3746_v18, %v3774_v48  ;;  %v1726_v48 = vmul.f32 %v2883_v35, %v3646_v56 }
 0x43f   : > { %1705 = vst.msk [vmem:[%s3550_s10 + $0x30] sm:$0xff] %vm1698_vm5, %v1663_v24 }
 0x441   : > { %v2016_v3 = vpop.permute.xlu1 %2015 }
 0x442   : > { %2059 = vst.msk [vmem:[%s3550_s10 + $0x28] sm:$0xff] %vm2053_vm6, %v2016_v3 }
 0x450   : > { %2105 = vadd.xlane.f32.xlu0 %v2104_v2  ;;  %v3998_v2 = vpop.f32.mrf.mxu1 }
 0x453   : > { %1753 = vadd.xlane.f32.xlu1 %v1752_v6  ;;  %v4000_v6 = vpop.f32.mrf.mxu1 }
 0x454   : > { %1756 = vadd.xlane.f32.xlu0 %v1755_v49  ;;  %v2079_v49 = vmul.f32 %v3972_v25, %v3642_v54  ;;  %v2080_v18 = vmul.f32 %v4000_v6, %v3648_v57  ;;  %v1767_v54 = vsel %vm988_vm3, %v1727_v52, 0.0  ;;  %v2889_v57 = vpop.f32.mrf.mxu0 }
 0x456   : > { %v1625_v8 = vpop.f32.mrf.mxu0 }
 0x464   : > { %1668 = vrot.lane.b32.xlu1 %v2880_v16, %s3093_s8 }
 0x46a   : > { %1670 = vrot.lane.b32.xlu0 %v1605_v43, %s3093_s8  ;;  %v2113_v43 = vsel %vm988_vm3, %v2079_v49, 0.0 }
 0x46f   : > { %v2100_v13 = vpop.xlane.xlu0 %2099 }
 0x470   : > { %v3966_v20 = vsel %vm2168_vm9, %v2156_v38, %v2100_v13  ;;  %v2116_v38 = vsel %vm988_vm3, %v2080_v18, 0.0  ;;  %v1764_v13 = vsel %vm988_vm3, %v1726_v48, 0.0 }
 0x472   : > { %v1748_v30 = vpop.xlane.xlu1 %1747 }
 0x473   : > { %v2018_v21 = vpop.permute.xlu0 %2017  ;;  %v2157_v24 = vsel %vm2151_vm7, %v2140_v4, %v1748_v30  ;;  %v1729_v4 = vmul.f32 %v1625_v8, %v3656_v61 }
 0x474   : > { %2060 = vst.msk [vmem:[%s3550_s10 + $0x30] sm:$0xff] %vm2053_vm6, %v2018_v21 }
 0x476   : > { %v1665_v42 = vpop.permute.xlu1 %1664 }
 0x477   : > { %1706 = vst.msk [vmem:[%s3550_s10 + $0x38] sm:$0xff] %vm1698_vm5, %v1665_v42 }
 0x488   : > { %2108 = vadd.xlane.f32.xlu1 %v2107_v31 }
 0x489   : > { %2111 = vadd.xlane.f32.xlu0 %v2110_v63  ;;  %v4025_v63 = vpop.f32.mrf.mxu1 }
 0x48c   : > { %1759 = vadd.xlane.f32.xlu1 %v1758_v46 }
 0x48d   : > { %1762 = vadd.xlane.f32.xlu0 %v1761_v50 }
 0x49d   : > { %1672 = vrot.lane.b32.xlu1 %v2883_v35, %s3093_s8  ;;  %v2141_v35 = vsel %vm2134_vm8, %v3748_v19, %v3777_v53  ;;  %v4027_v19 = vpop.f32.mrf.mxu1  ;;  %v2081_v53 = vmul.f32 %v3998_v2, %v3646_v56 }
 0x49e   : > { %v2082_v46 = vmul.f32 %v4027_v19, %v3652_v59  ;;  %v1773_v59 = vsel %vm988_vm3, %v1729_v4, 0.0 }
 0x49f   : > { %v4033_v50 = vpop.f32.mrf.mxu1 }
 0x4a3   : > { %1674 = vrot.lane.b32.xlu0 %v1615_v7, %s3093_s8  ;;  %v1728_v7 = vmul.f32 %v2886_v55, %v3650_v58 }
 0x4a4   : > { %v1751_v16 = vpop.xlane.xlu0 %1750 }
 0x4a5   : > { %v2158_v30 = vsel %vm2151_vm7, %v2141_v35, %v1751_v16  ;;  %v2119_v16 = vsel %vm988_vm3, %v2081_v53, 0.0  ;;  %v2085_v35 = vmul.f32 %v4033_v50, %v3654_v60  ;;  %v2145_v53 = vsel %vm2134_vm8, %v3798_v15, %v3825_v40 }
 0x4a7   : > { %v2103_v3 = vpop.xlane.xlu1 %2102 }
 0x4a8   : > { %v3992_v12 = vsel %vm2168_vm9, %v2157_v24, %v2103_v3  ;;  %v1667_v47 = vpop.permute.xlu0 %1666  ;;  %v2122_v24 = vsel %vm988_vm3, %v2082_v46, 0.0  ;;  %v4039_v3 = vpop.f32.mrf.mxu1 }
 0x4a9   : > { %1707 = vst.msk [vmem:[%s3550_s10 + $0x40] sm:$0xff] %vm1698_vm5, %v1667_v47  ;;  %v1770_v47 = vsel %vm988_vm3, %v1728_v7, 0.0  ;;  %v2084_v56 = vmul.f32 %v4039_v3, %v3656_v61 }
 0x4ab   : > { %v2020_v62 = vpop.permute.xlu1 %2019 }
 0x4ac   : > { %2061 = vst.msk [vmem:[%s3550_s10 + $0x38] sm:$0xff] %vm2053_vm6, %v2020_v62  ;;  %v2142_v62 = vsel %vm2134_vm8, %v3770_v41, %v3800_v17  ;;  %v2083_v41 = vmul.f32 %v4025_v63, %v3650_v58  ;;  %v1730_v17 = vmul.f32 %v2889_v57, %v3654_v60  ;;  %v2192_v58 = vsel %vm2185_vm10, %v3930_v51, -inf }
 0x4ad   : > { %v2143_v60 = vsel %vm2134_vm8, %v3772_v45, %v3802_v29 }
 0x4c1   : > { %2114 = vadd.xlane.f32.xlu1 %v2113_v43 }
 0x4c2   : > { %2117 = vadd.xlane.f32.xlu0 %v2116_v38 }
 0x4c5   : > { %1765 = vadd.xlane.f32.xlu1 %v1764_v13 }
 0x4c6   : > { %1768 = vadd.xlane.f32.xlu0 %v1767_v54  ;;  %v2125_v54 = vsel %vm988_vm3, %v2083_v41, 0.0 }
 0x4d6   : > { %1676 = vrot.lane.b32.xlu1 %v2886_v55, %s3093_s8  ;;  %v2128_v55 = vsel %vm988_vm3, %v2084_v56, 0.0 }
 0x4d9   : > { %v2106_v21 = vpop.xlane.xlu0 %2105 }
 0x4da   : > { %v4018_v42 = vsel %vm2168_vm9, %v2158_v30, %v2106_v21  ;;  %v1776_v30 = vsel %vm988_vm3, %v1730_v17, 0.0  ;;  %v2131_v21 = vsel %vm988_vm3, %v2085_v35, 0.0 }
 0x4dc   : > { %v1754_v5 = vpop.xlane.xlu1 %1753  ;;  %1678 = vrot.lane.b32.xlu0 %v1625_v8, %s3093_s8 }
 0x4dd   : > { %v1757_v22 = vpop.xlane.xlu0 %1756  ;;  %v2159_v49 = vsel %vm2151_vm7, %v2142_v62, %v1754_v5  ;;  %v2204_v5 = vsel %vm2185_vm10, %v4018_v42, -inf  ;;  %v2146_v62 = vsel %vm2134_vm8, %v3817_v28, %v3841_v11 }
 0x4de   : > { %v2160_v8 = vsel %vm2151_vm7, %v2143_v60, %v1757_v22 }
 0x4e0   : > { %v1669_v31 = vpop.permute.xlu1 %1668 }
 0x4e1   : > { %1708 = vst.msk [vmem:[%s3550_s10 + $0x48] sm:$0xff] %vm1698_vm5, %v1669_v31  ;;  %v1671_v44 = vpop.permute.xlu0 %1670 }
 0x4e2   : > { %1709 = vst.msk [vmem:[%s3550_s10 + $0x50] sm:$0xff] %vm1698_vm5, %v1671_v44 }
 0x4fa   : > { %2120 = vadd.xlane.f32.xlu1 %v2119_v16 }
 0x4fb   : > { %2123 = vadd.xlane.f32.xlu0 %v2122_v24  ;;  %v2189_v24 = vsel %vm2185_vm10, %v3909_v23, -inf }
 0x4fe   : > { %1771 = vadd.xlane.f32.xlu1 %v1770_v47  ;;  %v2201_v47 = vsel %vm2185_vm10, %v3992_v12, -inf }
 0x4ff   : > { %1774 = vadd.xlane.f32.xlu0 %v1773_v59 }
 0x503   : > { %2129 = vadd.xlane.f32.xlu0 %v2128_v55 }
 0x50f   : > { %1680 = vrot.lane.b32.xlu1 %v2889_v57, %s3093_s8  ;;  %v2198_v57 = vsel %vm2185_vm10, %v3966_v20, -inf }
 0x511   : > { %v2109_v18 = vpop.xlane.xlu1 %2108 }
 0x512   : > { %v4052_v61 = vsel %vm2168_vm9, %v2159_v49, %v2109_v18  ;;  %v2112_v48 = vpop.xlane.xlu0 %2111  ;;  %v2147_v49 = vsel %vm2134_vm8, %v3819_v37, %v3847_v33 }
 0x513   : > { %v4081_v31 = vsel %vm2168_vm9, %v2160_v8, %v2112_v48  ;;  %v2207_v59 = vsel %vm2185_vm10, %v4052_v61, -inf }
 0x514   : > { %v2210_v44 = vsel %vm2185_vm10, %v4081_v31, -inf }
 0x515   : > { %v1760_v43 = vpop.xlane.xlu1 %1759 }
 0x516   : > { %v1763_v52 = vpop.xlane.xlu0 %1762 }
 0x517   : > { %v2162_v29 = vsel %vm2151_vm7, %v2145_v53, %v1763_v52 }
 0x519   : > { %v1673_v38 = vpop.permute.xlu1 %1672  ;;  %2021 = vrot.lane.b32.xlu0 %v3974_v1, %s3094_s12  ;;  %v2186_v1 = vsel %vm2185_vm10, %v3894_v0, -inf }
 0x51a   : > { %1710 = vst.msk [vmem:[%s3550_s10 + $0x58] sm:$0xff] %vm1698_vm5, %v1673_v38  ;;  %v1675_v13 = vpop.permute.xlu0 %1674 }
 0x51b   : > { %1711 = vst.msk [vmem:[%s3550_s10 + $0x60] sm:$0xff] %vm1698_vm5, %v1675_v13  ;;  %v2149_v13 = vsel %vm2134_vm8, %v3839_v10, %v3876_v32  ;;  %v2148_v10 = vsel %vm2134_vm8, %v3836_v9, %v3861_v36  ;;  %v2150_v9 = vsel %vm2134_vm8, %v3858_v27, %v3878_v34 }
 0x533   : > { %2126 = vadd.xlane.f32.xlu1 %v2125_v54 }
 0x537   : > { %1777 = vadd.xlane.f32.xlu1 %v1776_v30 }
 0x538   : > { %2187 = vmax.xlane.f32.xlu0 %v2186_v1 }
 0x53b   : > { %2132 = vadd.xlane.f32.xlu1 %v2131_v21 }
 0x53c   : > { %2193 = vmax.xlane.f32.xlu0 %v2192_v58 }
 0x540   : > { %2199 = vmax.xlane.f32.xlu0 %v2198_v57 }
 0x544   : > { %2205 = vmax.xlane.f32.xlu0 %v2204_v5 }
 0x548   : > { %2211 = vmax.xlane.f32.xlu0 %v2210_v44 }
 0x54a   : > { %v2115_v45 = vpop.xlane.xlu1 %2114 }
 0x54b   : > { %v2118_v22 = vpop.xlane.xlu0 %2117 }
 0x54c   : > { %v4090_v46 = vsel %vm2168_vm9, %v2162_v29, %v2118_v22  ;;  %2023 = vrot.lane.b32.xlu1 %v3972_v25, %s3094_s12  ;;  %v2195_v25 = vsel %vm2185_vm10, %v3947_v26, -inf }
 0x54d   : > { %v2216_v7 = vsel %vm2185_vm10, %v4090_v46, -inf }
 0x54e   : > { %v1766_v16 = vpop.xlane.xlu1 %1765  ;;  %2217 = vmax.xlane.f32.xlu0 %v2216_v7 }
 0x54f   : > { %v1769_v4 = vpop.xlane.xlu0 %1768  ;;  %v2163_v18 = vsel %vm2151_vm7, %v2146_v62, %v1766_v16 }
 0x550   : > { %2025 = vrot.lane.b32.xlu1 %v4000_v6, %s3094_s12  ;;  %v2144_v6 = vsel %vm2134_vm8, %v3796_v14, %v3822_v39  ;;  %v2164_v48 = vsel %vm2151_vm7, %v2147_v49, %v1769_v4 }
 0x551   : > { %v2161_v56 = vsel %vm2151_vm7, %v2144_v6, %v1760_v43 }
 0x552   : > { %v1677_v15 = vpop.permute.xlu1 %1676  ;;  %v4115_v55 = vsel %vm2168_vm9, %v2161_v56, %v2115_v45 }
 0x553   : > { %1712 = vst.msk [vmem:[%s3550_s10 + $0x68] sm:$0xff] %vm1698_vm5, %v1677_v15  ;;  %v1679_v40 = vpop.permute.xlu0 %1678  ;;  %v2213_v39 = vsel %vm2185_vm10, %v4115_v55, -inf }
 0x554   : > { %1713 = vst.msk [vmem:[%s3550_s10 + $0x70] sm:$0xff] %vm1698_vm5, %v1679_v40 }
 0x574   : > { %2190 = vmax.xlane.f32.xlu1 %v2189_v24 }
 0x578   : > { %2196 = vmax.xlane.f32.xlu1 %v2195_v25 }
 0x57c   : > { %2202 = vmax.xlane.f32.xlu1 %v2201_v47 }
 0x580   : > { %2208 = vmax.xlane.f32.xlu1 %v2207_v59 }
 0x583   : > { %v2121_v14 = vpop.xlane.xlu1 %2120 }
 0x584   : > { %v4128_v43 = vsel %vm2168_vm9, %v2163_v18, %v2121_v14  ;;  %2214 = vmax.xlane.f32.xlu1 %v2213_v39  ;;  %v2124_v52 = vpop.xlane.xlu0 %2123 }
 0x585   : > { %v4131_v28 = vsel %vm2168_vm9, %v2164_v48, %v2124_v52  ;;  %v2219_v33 = vsel %vm2185_vm10, %v4128_v43, -inf }
 0x586   : > { %v2222_v37 = vsel %vm2185_vm10, %v4131_v28, -inf }
 0x587   : > { %v1772_v11 = vpop.xlane.xlu1 %1771  ;;  %2223 = vmax.xlane.f32.xlu0 %v2222_v37 }
 0x588   : > { %2220 = vmax.xlane.f32.xlu1 %v2219_v33  ;;  %v1775_v38 = vpop.xlane.xlu0 %1774  ;;  %v2165_v32 = vsel %vm2151_vm7, %v2148_v10, %v1772_v11 }
 0x589   : > { %v2166_v17 = vsel %vm2151_vm7, %v2149_v13, %v1775_v38 }
 0x58b   : > { %v1681_v41 = vpop.permute.xlu1 %1680 }
 0x58c   : > { %1714 = vst.msk [vmem:[%s3550_s10 + $0x78] sm:$0xff] %vm1698_vm5, %v1681_v41  ;;  %v2130_v54 = vpop.xlane.xlu0 %2129 }
 0x58d   : > { %v4144_v35 = vsel %vm2168_vm9, %v2166_v17, %v2130_v54 }
 0x58e   : > { %v2228_v30 = vsel %vm2185_vm10, %v4144_v35, -inf }
 0x58f   : > { %2229 = vmax.xlane.f32.xlu0 %v2228_v30 }
 0x590   : > { %v2022_v1 = vpop.permute.xlu0 %2021 }
 0x591   : > { %2062 = vst.msk [vmem:[%s3550_s10 + $0x40] sm:$0xff] %vm2053_vm6, %v2022_v1 }
 0x5a5   : > { %2029 = vrot.lane.b32.xlu0 %v4027_v19, %s3094_s12 }
 0x5bc   : > { %v2127_v21 = vpop.xlane.xlu1 %2126 }
 0x5bd   : > { %v4157_v58 = vsel %vm2168_vm9, %v2165_v32, %v2127_v21 }
 0x5be   : > { %v2225_v57 = vsel %vm2185_vm10, %v4157_v58, -inf }
 0x5bf   : > { %2226 = vmax.xlane.f32.xlu1 %v2225_v57 }
 0x5c0   : > { %v1778_v60 = vpop.xlane.xlu1 %1777 }
 0x5c1   : > { %v2188_v8 = vpop.xlane.xlu0 %2187  ;;  %v2167_v36 = vsel %vm2151_vm7, %v2150_v9, %v1778_v60 }
 0x5c2   : > { %v2234_v19 = vsub.f32 %v3894_v0, %v2188_v8 }
 0x5c4   : > { %v2250_v5 = vmul.f32 1.442695, %v2234_v19  ;;  %v2133_v44 = vpop.xlane.xlu1 %2132 }
 0x5c5   : > { %v4167_v53 = vsel %vm2168_vm9, %v2167_v36, %v2133_v44  ;;  %v2194_v34 = vpop.xlane.xlu0 %2193 }
 0x5c6   : > { %2966 = vpow2.f32 %v2250_v5  ;;  %v2231_v45 = vsel %vm2185_vm10, %v4167_v53, -inf  ;;  %v2236_v15 = vsub.f32 %v3930_v51, %v2194_v34 }
 0x5c7   : > { %2232 = vmax.xlane.f32.xlu1 %v2231_v45 }
 0x5c8   : > { %v2024_v29 = vpop.permute.xlu1 %2023  ;;  %v2254_v6 = vmul.f32 1.442695, %v2236_v15 }
 0x5c9   : > { %2063 = vst.msk [vmem:[%s3550_s10 + $0x48] sm:$0xff] %vm2053_vm6, %v2024_v29  ;;  %v2200_v7 = vpop.xlane.xlu0 %2199 }
 0x5ca   : > { %v2238_v56 = vsub.f32 %v3966_v20, %v2200_v7 }
 0x5cc   : > { %v2026_v0 = vpop.permute.xlu1 %2025  ;;  %v2258_v62 = vmul.f32 1.442695, %v2238_v56 }
 0x5cd   : > { %2064 = vst.msk [vmem:[%s3550_s10 + $0x50] sm:$0xff] %vm2053_vm6, %v2026_v0  ;;  %v2206_v25 = vpop.xlane.xlu0 %2205 }
 0x5d1   : > { %v2212_v49 = vpop.xlane.xlu0 %2211 }
 0x5d3   : > { %v4175_v22 = vpop.eup %2966 }
 0x5d4   : > { %v2282_v27 = vsel %vm2185_vm10, %v4175_v22, 0.0 }
 0x5d5   : > { %2283 = vadd.xlane.f32.xlu0 %v2282_v27 }
 0x5d7   : > { %v2218_v48 = vpop.xlane.xlu0 %2217 }
 0x5d8   : > { %2027 = vrot.lane.b32.xlu1 %v3998_v2, %s3094_s12 }
 0x5dc   : > { %2031 = vrot.lane.b32.xlu1 %v4025_v63, %s3094_s12 }
 0x5fd   : > { %v2191_v16 = vpop.xlane.xlu1 %2190 }
 0x5fe   : > { %v2235_v4 = vsub.f32 %v3909_v23, %v2191_v16  ;;  %v2240_v23 = vsub.f32 %v4018_v42, %v2206_v25  ;;  %v2244_v42 = vsub.f32 %v4090_v46, %v2218_v48 }
 0x600   : > { %v2252_v40 = vmul.f32 1.442695, %v2235_v4  ;;  %v2262_v39 = vmul.f32 1.442695, %v2240_v23 }
 0x601   : > { %v2197_v24 = vpop.xlane.xlu1 %2196 }
 0x602   : > { %2968 = vpow2.f32 %v2252_v40  ;;  %v2237_v47 = vsub.f32 %v3947_v26, %v2197_v24  ;;  %v2242_v26 = vsub.f32 %v4081_v31, %v2212_v49 }
 0x604   : > { %v2256_v2 = vmul.f32 1.442695, %v2237_v47  ;;  %v2266_v11 = vmul.f32 1.442695, %v2242_v26 }
 0x605   : > { %v2203_v59 = vpop.xlane.xlu1 %2202 }
 0x606   : > { %2970 = vpow2.f32 %v2256_v2  ;;  %v2239_v63 = vsub.f32 %v3992_v12, %v2203_v59 }
 0x607   : > { %2972 = vpow2.f32 %v2254_v6 }
 0x608   : > { %v2260_v51 = vmul.f32 1.442695, %v2239_v63 }
 0x609   : > { %v2209_v18 = vpop.xlane.xlu1 %2208 }
 0x60a   : > { %2974 = vpow2.f32 %v2260_v51  ;;  %v2241_v14 = vsub.f32 %v4052_v61, %v2209_v18 }
 0x60b   : > { %2976 = vpow2.f32 %v2258_v62 }
 0x60c   : > { %v2264_v20 = vmul.f32 1.442695, %v2241_v14 }
 0x60d   : > { %v2215_v52 = vpop.xlane.xlu1 %2214 }
 0x60e   : > { %2978 = vpow2.f32 %v2264_v20  ;;  %v2243_v12 = vsub.f32 %v4115_v55, %v2215_v52  ;;  %v2270_v55 = vmul.f32 1.442695, %v2244_v42 }
 0x60f   : > { %v4192_v37 = vpop.eup %2968  ;;  %2980 = vpow2.f32 %v2262_v39 }
 0x610   : > { %v2268_v33 = vmul.f32 1.442695, %v2243_v12  ;;  %v2285_v61 = vsel %vm2185_vm10, %v4192_v37, 0.0  ;;  %v2224_v38 = vpop.xlane.xlu0 %2223 }
 0x611   : > { %2286 = vadd.xlane.f32.xlu1 %v2285_v61  ;;  %v2221_v31 = vpop.xlane.xlu1 %2220  ;;  %v2246_v17 = vsub.f32 %v4131_v28, %v2224_v38 }
 0x612   : > { %2982 = vpow2.f32 %v2268_v33  ;;  %v2245_v13 = vsub.f32 %v4128_v43, %v2221_v31 }
 0x613   : > { %v4198_v41 = vpop.eup %2970  ;;  %2984 = vpow2.f32 %v2266_v11  ;;  %v2274_v10 = vmul.f32 1.442695, %v2246_v17 }
 0x614   : > { %v2272_v54 = vmul.f32 1.442695, %v2245_v13  ;;  %v2291_v46 = vsel %vm2185_vm10, %v4198_v41, 0.0  ;;  %v4203_v30 = vpop.eup %2972 }
 0x615   : > { %2292 = vadd.xlane.f32.xlu0 %v2291_v46  ;;  %v2288_v28 = vsel %vm2185_vm10, %v4203_v30, 0.0 }
 0x616   : > { %2986 = vpow2.f32 %v2272_v54 }
 0x617   : > { %v4205_v1 = vpop.eup %2974  ;;  %2988 = vpow2.f32 %v2270_v55 }
 0x618   : > { %v2230_v43 = vpop.xlane.xlu0 %2229  ;;  %v2297_v32 = vsel %vm2185_vm10, %v4205_v1, 0.0  ;;  %v4211_v21 = vpop.eup %2976  ;;  %2990 = vpow2.f32 %v2274_v10 }
 0x619   : > { %v2248_v57 = vsub.f32 %v4144_v35, %v2230_v43  ;;  %2298 = vadd.xlane.f32.xlu1 %v2297_v32  ;;  %2289 = vadd.xlane.f32.xlu0 %v2288_v28  ;;  %v2294_v36 = vsel %vm2185_vm10, %v4211_v21, 0.0 }
 0x61b   : > { %v4214_v60 = vpop.eup %2978  ;;  %v2278_v8 = vmul.f32 1.442695, %v2248_v57 }
 0x61c   : > { %v2030_v19 = vpop.permute.xlu0 %2029  ;;  %v2303_v9 = vsel %vm2185_vm10, %v4214_v60, 0.0  ;;  %v4220_v5 = vpop.eup %2980 }
 0x61d   : > { %2066 = vst.msk [vmem:[%s3550_s10 + $0x60] sm:$0xff] %vm2053_vm6, %v2030_v19  ;;  %2304 = vadd.xlane.f32.xlu1 %v2303_v9  ;;  %2295 = vadd.xlane.f32.xlu0 %v2294_v36  ;;  %2992 = vpow2.f32 %v2278_v8  ;;  %v2300_v29 = vsel %vm2185_vm10, %v4220_v5, 0.0 }
 0x61f   : > { %v4224_v35 = vpop.eup %2982 }
 0x620   : > { %v4226_v44 = vpop.eup %2984  ;;  %v2309_v45 = vsel %vm2185_vm10, %v4224_v35, 0.0 }
 0x621   : > { %2310 = vadd.xlane.f32.xlu1 %v2309_v45  ;;  %2301 = vadd.xlane.f32.xlu0 %v2300_v29  ;;  %v2306_v34 = vsel %vm2185_vm10, %v4226_v44, 0.0 }
 0x623   : > { %v4232_v0 = vpop.eup %2986 }
 0x624   : > { %v2315_v27 = vsel %vm2185_vm10, %v4232_v0, 0.0  ;;  %v4238_v7 = vpop.eup %2988 }
 0x625   : > { %2316 = vadd.xlane.f32.xlu1 %v2315_v27  ;;  %2307 = vadd.xlane.f32.xlu0 %v2306_v34  ;;  %v2312_v16 = vsel %vm2185_vm10, %v4238_v7, 0.0  ;;  %v4242_v4 = vpop.eup %2990 }
 0x626   : > { %v2318_v15 = vsel %vm2185_vm10, %v4242_v4, 0.0 }
 0x629   : > { %2313 = vadd.xlane.f32.xlu0 %v2312_v16 }
 0x62a   : > { %v4246_v40 = vpop.eup %2992 }
 0x62b   : > { %v2324_v24 = vsel %vm2185_vm10, %v4246_v40, 0.0 }
 0x62d   : > { %2319 = vadd.xlane.f32.xlu0 %v2318_v15 }
 0x631   : > { %2325 = vadd.xlane.f32.xlu0 %v2324_v24 }
 0x647   : > { %2033 = vrot.lane.b32.xlu0 %v4039_v3, %s3094_s12 }
 0x648   : > { %v2227_v25 = vpop.xlane.xlu1 %2226 }
 0x649   : > { %v2247_v47 = vsub.f32 %v4157_v58, %v2227_v25 }
 0x64b   : > { %v2276_v6 = vmul.f32 1.442695, %v2247_v47 }
 0x64d   : > { %2994 = vpow2.f32 %v2276_v6 }
 0x650   : > { %v2233_v56 = vpop.xlane.xlu1 %2232 }
 0x651   : > { %v2249_v2 = vsub.f32 %v4167_v53, %v2233_v56 }
 0x653   : > { %v2280_v59 = vmul.f32 1.442695, %v2249_v2 }
 0x654   : > { %v2028_v63 = vpop.permute.xlu1 %2027 }
 0x655   : > { %2996 = vpow2.f32 %v2280_v59  ;;  %2065 = vst.msk [vmem:[%s3550_s10 + $0x58] sm:$0xff] %vm2053_vm6, %v2028_v63 }
 0x658   : > { %v2032_v62 = vpop.permute.xlu1 %2031 }
 0x659   : > { %2067 = vst.msk [vmem:[%s3550_s10 + $0x68] sm:$0xff] %vm2053_vm6, %v2032_v62 }
 0x65a   : > { %v4258_v23 = vpop.eup %2994 }
 0x65b   : > { %v2321_v3 = vsel %vm2185_vm10, %v4258_v23, 0.0 }
 0x65c   : > { %2322 = vadd.xlane.f32.xlu1 %v2321_v3 }
 0x65e   : > { %v2284_v58 = vpop.xlane.xlu0 %2283 }
 0x65f   : > { %2998 = vrcp.f32 %v2284_v58 }
 0x662   : > { %v4262_v49 = vpop.eup %2996 }
 0x663   : > { %v2327_v53 = vsel %vm2185_vm10, %v4262_v49, 0.0 }
 0x664   : > { %2328 = vadd.xlane.f32.xlu1 %v2327_v53 }
 0x66c   : > { %v2999_v51 = vpop.eup %2998 }
 0x66d   : > { %v2331_v18 = vmul.f32 %v2999_v51, %v4175_v22 }
 0x66f   : > { %2362 = vst.msk [vmem:[%s4271_s16] sm:$0xff] %vm2185_vm10, %v2331_v18 }
 0x675   : > { %2035 = vrot.lane.b32.xlu1 %v4033_v50, %s3094_s12 }
 0x69a   : > { %v2287_v14 = vpop.xlane.xlu1 %2286 }
 0x69b   : > { %3000 = vrcp.f32 %v2287_v14 }
 0x69e   : > { %v2293_v26 = vpop.xlane.xlu0 %2292 }
 0x69f   : > { %3002 = vrcp.f32 %v2293_v26 }
 0x6a2   : > { %v2299_v39 = vpop.xlane.xlu1 %2298  ;;  %v2290_v20 = vpop.xlane.xlu0 %2289 }
 0x6a3   : > { %3004 = vrcp.f32 %v2299_v39 }
 0x6a4   : > { %3006 = vrcp.f32 %v2290_v20 }
 0x6a6   : > { %v2305_v48 = vpop.xlane.xlu1 %2304  ;;  %v2296_v52 = vpop.xlane.xlu0 %2295 }
 0x6a7   : > { %3008 = vrcp.f32 %v2305_v48 }
 0x6a8   : > { %v3001_v12 = vpop.eup %3000  ;;  %3010 = vrcp.f32 %v2296_v52 }
 0x6a9   : > { %v2333_v22 = vmul.f32 %v3001_v12, %v4192_v37 }
 0x6aa   : > { %v2311_v11 = vpop.xlane.xlu1 %2310  ;;  %v2302_v42 = vpop.xlane.xlu0 %2301 }
 0x6ab   : > { %2363 = vst.msk [vmem:[%s4271_s16 + $0x8] sm:$0xff] %vm2185_vm10, %v2333_v22  ;;  %3012 = vrcp.f32 %v2311_v11 }
 0x6ac   : > { %v3003_v50 = vpop.eup %3002  ;;  %3014 = vrcp.f32 %v2302_v42 }
 0x6ad   : > { %v2337_v33 = vmul.f32 %v3003_v50, %v4198_v41 }
 0x6ae   : > { %v2317_v61 = vpop.xlane.xlu1 %2316  ;;  %v2308_v38 = vpop.xlane.xlu0 %2307 }
 0x6af   : > { %2365 = vst.msk [vmem:[%s4271_s16 + $0x18] sm:$0xff] %vm2185_vm10, %v2337_v33  ;;  %3016 = vrcp.f32 %v2317_v61 }
 0x6b0   : > { %v3005_v31 = vpop.eup %3004  ;;  %3018 = vrcp.f32 %v2308_v38 }
 0x6b1   : > { %v3007_v37 = vpop.eup %3006  ;;  %v2341_v13 = vmul.f32 %v3005_v31, %v4205_v1 }
 0x6b2   : > { %v2335_v55 = vmul.f32 %v3007_v37, %v4203_v30  ;;  %v2314_v17 = vpop.xlane.xlu0 %2313 }
 0x6b3   : > { %2367 = vst.msk [vmem:[%s4271_s16 + $0x28] sm:$0xff] %vm2185_vm10, %v2341_v13  ;;  %3020 = vrcp.f32 %v2314_v17 }
 0x6b4   : > { %v3009_v41 = vpop.eup %3008  ;;  %2364 = vst.msk [vmem:[%s4271_s16 + $0x10] sm:$0xff] %vm2185_vm10, %v2335_v55 }
 0x6b5   : > { %v3011_v54 = vpop.eup %3010  ;;  %v2345_v46 = vmul.f32 %v3009_v41, %v4214_v60 }
 0x6b6   : > { %v2339_v10 = vmul.f32 %v3011_v54, %v4211_v21  ;;  %v2320_v43 = vpop.xlane.xlu0 %2319 }
 0x6b7   : > { %2369 = vst.msk [vmem:[%s4271_s16 + $0x38] sm:$0xff] %vm2185_vm10, %v2345_v46  ;;  %3022 = vrcp.f32 %v2320_v43 }
 0x6b8   : > { %v3013_v30 = vpop.eup %3012  ;;  %2366 = vst.msk [vmem:[%s4271_s16 + $0x20] sm:$0xff] %vm2185_vm10, %v2339_v10 }
 0x6b9   : > { %v3015_v1 = vpop.eup %3014  ;;  %v2349_v32 = vmul.f32 %v3013_v30, %v4224_v35 }
 0x6ba   : > { %v2343_v28 = vmul.f32 %v3015_v1, %v4220_v5  ;;  %v2326_v57 = vpop.xlane.xlu0 %2325 }
 0x6bb   : > { %2371 = vst.msk [vmem:[%s4271_s16 + $0x48] sm:$0xff] %vm2185_vm10, %v2349_v32  ;;  %3024 = vrcp.f32 %v2326_v57 }
 0x6bc   : > { %v3017_v21 = vpop.eup %3016  ;;  %2368 = vst.msk [vmem:[%s4271_s16 + $0x30] sm:$0xff] %vm2185_vm10, %v2343_v28 }
 0x6bd   : > { %v3019_v60 = vpop.eup %3018  ;;  %v2353_v8 = vmul.f32 %v3017_v21, %v4232_v0 }
 0x6be   : > { %v2347_v19 = vmul.f32 %v3019_v60, %v4226_v44  ;;  %v2034_v9 = vpop.permute.xlu0 %2033 }
 0x6bf   : > { %2373 = vst.msk [vmem:[%s4271_s16 + $0x58] sm:$0xff] %vm2185_vm10, %v2353_v8 }
 0x6c0   : > { %2068 = vst.msk [vmem:[%s3550_s10 + $0x70] sm:$0xff] %vm2053_vm6, %v2034_v9  ;;  %v3021_v36 = vpop.eup %3020 }
 0x6c1   : > { %2370 = vst.msk [vmem:[%s4271_s16 + $0x40] sm:$0xff] %vm2185_vm10, %v2347_v19  ;;  %v2351_v5 = vmul.f32 %v3021_v36, %v4238_v7 }
 0x6c3   : > { %2372 = vst.msk [vmem:[%s4271_s16 + $0x50] sm:$0xff] %vm2185_vm10, %v2351_v5 }
 0x6c4   : > { %v3023_v35 = vpop.eup %3022 }
 0x6c5   : > { %v2355_v45 = vmul.f32 %v3023_v35, %v4242_v4 }
 0x6c7   : > { %2374 = vst.msk [vmem:[%s4271_s16 + $0x60] sm:$0xff] %vm2185_vm10, %v2355_v45 }
 0x6c8   : > { %v3025_v44 = vpop.eup %3024 }
 0x6c9   : > { %v2359_v29 = vmul.f32 %v3025_v44, %v4246_v40 }
 0x6cb   : > { %2376 = vst.msk [vmem:[%s4271_s16 + $0x70] sm:$0xff] %vm2185_vm10, %v2359_v29 }
 0x6e5   : > { %v2323_v0 = vpop.xlane.xlu1 %2322 }
 0x6e6   : > { %3026 = vrcp.f32 %v2323_v0 }
 0x6ed   : > { %v2329_v27 = vpop.xlane.xlu1 %2328 }
 0x6ee   : > { %3028 = vrcp.f32 %v2329_v27 }
 0x6f1   : > { %v2036_v34 = vpop.permute.xlu1 %2035 }
 0x6f2   : > { %2069 = vst.msk [vmem:[%s3550_s10 + $0x78] sm:$0xff] %vm2053_vm6, %v2036_v34 }
 0x6f3   : > { %v3027_v7 = vpop.eup %3026 }
 0x6f4   : > { %3043 = shalt.err (!%p3040_p7)
}
 0x6f5   : > { %s3044_s10 = scalar_lea.hbm %s4324_s30, 2048  ;;  %s3048_s13 = scalar_lea.hbm %s4382_s5, 4096 }
 0x6f6   : > { %p3045_p10 = scmp.ne.s32.totalorder %s4324_s30, %s3044_s10  ;;  %p3049_p13 = scmp.lt.s32.totalorder %s4324_s30, %s4382_s5 }
 0x6f7   : > { %p3050_p0 = scmp.lt.s32.totalorder %s3048_s13, %s3044_s10 }
 0x6f8   : > { %p3046_p11 = pnand %p3045_p10, %p3167_p6 }
 0x6f9   : > { %p3051_p1 = por %p3050_p0, %p3049_p13 }
 0x6fa   : > { %p3047_p12 = pneg %p3046_p11 }
 0x6fc   : > { %p3052_p2 = pnand %p3051_p1, %p3047_p12 }
 0x6fe   : > { %3055 = shalt.err (!%p3052_p2)
}
 0x6ff   : > { %s3096_s17 = smov 128   ;;  %s3097_s25 = smov 8   ;;  %v2357_v16 = vmul.f32 %v3027_v7, %v4258_v23  ;;  %v3029_v4 = vpop.eup %3028 }
 0x700   : > { %2922 = dma.vmem_to_hbm [thread:$0]  (%p3167_p6), %s4326_s14, 2048, %s4324_s30, %s2384_s6, %s3096_s17, %s3096_s17, %s3097_s25   ;;  %v2361_v15 = vmul.f32 %v3029_v4, %v4262_v49 }
 0x701   : > { %2375 = vst.msk [vmem:[%s4271_s16 + $0x68] sm:$0xff] %vm2185_vm10, %v2357_v16 }
 0x702   : > { %2377 = vst.msk [vmem:[%s4271_s16 + $0x78] sm:$0xff] %vm2185_vm10, %v2361_v15 }
 0x703 PF: > { %s2424_s7 = sand.u32 1, %s3078_s18   ;;  %p2925_p3 = pnand %p2508_p9, %p3171_p8 }
 0x704   : > { %s2425_s28 = scalar_lea.sflag [#allocation4], %s2424_s7 }
 0x705   : > { %p2926_p4 = pneg %p2925_p3 }
 0x707   : > { %3073 = dma.done.wait (%p2926_p4), %s2425_s28, 2048  }
 0x708   : > { %3075 = vsyncadd (%p2926_p4), %s2425_s28, 4294965248  ;;  %p16_p6 = scmp.ge.s32.totalorder %s3153_s24, 4   ;;  %s4385_s18 = smov %s3082_s19 }
 0x709   : > { %s4386_s19 = smov %s3086_s20  ;;  %s4387_s20 = smov %s3165_s27 }
 0x70a   : > { %s4388_s21 = smov %s3153_s24  ;;  %18 = sbr.rel (!%p16_p6) target bundleno = 3 (0x3), region = 132 }
 0x70f   :  { %2430 = vsyncpa [#allocation4], 1 }
 0x710   :  { %2432 = vsyncpa [#allocation4 + $0x1], 1 }

</bundles_post_ra>
